<compile_context>
chip_gen: v7x
topology: tpu7x:2x2x1
jax: 0.10.0
libtpu: 0.0.40
codegen_flags: <defaults>
</compile_context>

<pallas_src>
import jax
import jax.numpy as jnp
from jax.experimental import pallas as pl
from jax.experimental.pallas import tpu as pltpu


def _sine_layer_kernel(x_ref, w_ref, b_ref, o_ref):
    # omega_0 is pre-folded into W and b, so the epilogue is only bias-add +
    # sin.  The operand cast happens in-kernel (VPU slot has slack) so the
    # wrapper never makes a separate HBM pass over x.
    x = x_ref[...].astype(w_ref.dtype)
    acc = jnp.dot(x, w_ref[...], preferred_element_type=jnp.float32)
    o_ref[...] = jnp.sin(acc + b_ref[...]).astype(o_ref.dtype)
    # TODO(synk): at SIREN widths the sin polynomial on the VPU is the binding
    # slot on v6e/v7x; a packed-bf16 sine evaluation could ~2x the epilogue if
    # accuracy allows (not on v5e: no bf16 VPU).


def _round_up(x, m):
    return (x + m - 1) // m * m


def _vmem_budget_bytes():
    """Generation-aware VMEM budget: ~half of physical capacity.

    v5e/v6e: 128 MiB -> 64 MiB budget; v7x: 64 MiB/TC -> 32 MiB budget.
    Falls back to 32 MiB if the hardware query is unavailable.
    """
    try:
        cap = int(pltpu.get_tpu_info().vmem_capacity_bytes)
    except Exception:
        cap = 64 << 20
    return max(16 << 20, cap // 2)


def _select_tiles(M, K, N, x_itemsize, w_itemsize, out_itemsize, budget,
                  block_m_req):
    """Pick (block_m, block_n) fitting `budget` bytes of VMEM.

    Accounting: double-buffered x tile + double-buffered out tile; weight and
    bias single-buffered when grid-constant (block_n == N), double-buffered
    when N is split.
    """
    # Output-feature tile: full N if the resident weight is cheap, otherwise
    # split N into lane-aligned tiles so the weight never dominates VMEM.
    block_n, w_bufs = N, 1
    if N > 128 and K * N * w_itemsize > budget // 2:
        w_bufs = 2
        bn = ((budget // 2) // (w_bufs * K * w_itemsize)) // 128 * 128
        block_n = min(N, max(128, bn))
        if block_n == N:
            w_bufs = 1

    fixed = w_bufs * (K * block_n * w_itemsize + block_n * 4)
    per_row = 2 * K * x_itemsize + 2 * block_n * out_itemsize
    bm_cap = (budget - fixed) // per_row
    bm_cap = (bm_cap // 128) * 128
    if bm_cap < 128:
        raise ValueError(
            "SineLayer tile selection: even a 128-row batch tile does not fit "
            f"the VMEM budget (K={K}, block_n={block_n}, budget={budget} B). "
            "A K-split with an f32 accumulator scratch is needed for this shape.")

    # Keep several grid steps for DMA/compute overlap (and work for both TCs
    # on multi-core parts) when M is small; full 128-row MXU passes.
    steps_cap = max(128, _round_up(pl.cdiv(M, 8), 128))
    block_m = min(block_m_req, bm_cap, steps_cap)
    block_m = max(128, (block_m // 128) * 128)
    return block_m, block_n


def prepare_sine_layer_params(weight, bias, omega_0, *,
                              compute_dtype=jnp.bfloat16):
    """Fold omega_0 into the params once and pre-transpose the weight.

    weight: (out_features, in_features)  -- PyTorch nn.Linear convention
    bias:   (out_features,)
    Returns W' = (omega_0 * W)^T of shape (K, N) in `compute_dtype` (bf16 by
    default: halves weight/x DMA bytes and avoids multi-pass f32 MXU
    emulation; pass jnp.float32 for an exact-operand path) and
    b' = omega_0 * b of shape (1, N) kept in f32 (bias, accumulator and sine
    argument stay f32 in the kernel).
    """
    w_p = (jnp.asarray(weight, jnp.float32) * omega_0).T.astype(compute_dtype)
    b_p = (jnp.asarray(bias, jnp.float32) * omega_0).reshape(1, -1)
    return w_p, b_p


def sine_layer(x, w_prepped, b_prepped, *, block_m=512, out_dtype=None):
    """y = sin(x @ W' + b') with (W', b') from prepare_sine_layer_params."""
    M, K = x.shape
    K2, N = w_prepped.shape
    assert K == K2
    assert b_prepped.shape == (1, N)
    out_dtype = x.dtype if out_dtype is None else out_dtype

    budget = _vmem_budget_bytes()
    block_m, block_n = _select_tiles(
        M, K, N,
        jnp.dtype(x.dtype).itemsize,
        jnp.dtype(w_prepped.dtype).itemsize,
        jnp.dtype(out_dtype).itemsize,
        budget - (2 << 20),     # headroom for compiler scratch
        block_m)

    grid = (pl.cdiv(M, block_m), pl.cdiv(N, block_n))

    if grid[1] == 1:
        # Weight and bias are grid-constant -> single VMEM buffer each.
        w_spec = pl.BlockSpec((K, block_n), lambda i, j: (0, 0),
                              pipeline_mode=pl.Buffered(1))
        b_spec = pl.BlockSpec((1, block_n), lambda i, j: (0, 0),
                              pipeline_mode=pl.Buffered(1))
    else:
        w_spec = pl.BlockSpec((K, block_n), lambda i, j: (0, j))
        b_spec = pl.BlockSpec((1, block_n), lambda i, j: (0, j))

    return pl.pallas_call(
        _sine_layer_kernel,
        out_shape=jax.ShapeDtypeStruct((M, N), out_dtype),
        grid=grid,
        in_specs=[
            pl.BlockSpec((block_m, K), lambda i, j: (i, 0)),
            w_spec,
            b_spec,
        ],
        out_specs=pl.BlockSpec((block_m, block_n), lambda i, j: (i, j)),
        compiler_params=pltpu.CompilerParams(
            # Both batch and output-feature tiles are independent.
            dimension_semantics=("parallel", "parallel"),
            vmem_limit_bytes=int(budget),
        ),
    )(x, w_prepped, b_prepped)


def init_sine_layer_params(key, in_features, out_features, is_first, omega_0):
    """Deterministic init matching SineLayer.init_weights (+ default bias init)."""
    kw, kb = jax.random.split(key)
    if is_first:
        bound_w = 1.0 / in_features
    else:
        bound_w = float(jnp.sqrt(6.0 / in_features)) / omega_0
    weight = jax.random.uniform(
        kw, (out_features, in_features), jnp.float32, -bound_w, bound_w)
    # nn.Linear default bias init: U(-1/sqrt(in), 1/sqrt(in))
    bound_b = 1.0 / float(jnp.sqrt(float(in_features)))
    bias = jax.random.uniform(kb, (out_features,), jnp.float32, -bound_b, bound_b)
    return weight, bias


if __name__ == "__main__":
    key = jax.random.PRNGKey(0)
    k_x, k_p = jax.random.split(key)

    # Small SIREN-like layer; ragged batch (not a tile multiple) exercises the
    # masked partial-tile store path.
    batch, in_features, out_features = 300, 64, 128
    omega_0 = 30.0
    is_first = True

    x = jax.random.normal(k_x, (batch, in_features), jnp.float32)
    weight, bias = init_sine_layer_params(
        k_p, in_features, out_features, is_first, omega_0)

    # Pure-JAX reference (PyTorch semantics).
    ref = jnp.sin(omega_0 * (x @ weight.T + bias))

    # Exact f32-operand path.
    w32, b32 = prepare_sine_layer_params(weight, bias, omega_0,
                                         compute_dtype=jnp.float32)
    out32 = jax.block_until_ready(sine_layer(x, w32, b32))
    assert out32.shape == (batch, out_features)
    assert out32.dtype == jnp.float32
    assert jnp.allclose(out32, ref, atol=2e-3, rtol=2e-3)

    # Default bf16-operand path (f32 accumulator + f32 sine arg); sin(omega*z)
    # amplifies operand quantization -> looser tolerance.
    wbf, bbf = prepare_sine_layer_params(weight, bias, omega_0)
    outbf = jax.block_until_ready(sine_layer(x, wbf, bbf))
    assert jnp.allclose(outbf, ref, atol=1e-1)

    # bf16 output (for chaining into the next SIREN layer).
    outbf16 = jax.block_until_ready(
        sine_layer(x, wbf, bbf, out_dtype=jnp.bfloat16))
    assert outbf16.shape == (batch, out_features)
    assert outbf16.dtype == jnp.bfloat16
    assert jnp.allclose(outbf16.astype(jnp.float32), ref, atol=1.5e-1)

    print("KERNEL_OK")
</pallas_src>

<mosaic_0001>
module attributes {stable_mosaic.version = 11 : i64} {
  func.func @_sine_layer_kernel(%arg0: i32, %arg1: i32, %arg2: memref<128x64xf32, #tpu.memory_space<vmem>>, %arg3: memref<64x128xf32, #tpu.memory_space<vmem>>, %arg4: memref<1x128xf32, #tpu.memory_space<vmem>>, %arg5: memref<128x128xf32, #tpu.memory_space<vmem>>) attributes {dimension_semantics = [#tpu.dimension_semantics<parallel>, #tpu.dimension_semantics<parallel>], iteration_bounds = array<i64: 3, 1>, scalar_prefetch = 0 : i64, scratch_operands = 0 : i64, tpu.core_type = #tpu.core_type<tc>, window_params = [{transform_indices = @transform_0, window_bounds = array<i64: 128, 64>}, {pipeline_mode = #tpu.pipeline_mode<synchronous>, transform_indices = @transform_1, window_bounds = array<i64: 64, 128>}, {pipeline_mode = #tpu.pipeline_mode<synchronous>, transform_indices = @transform_2, window_bounds = array<i64: 1, 128>}, {transform_indices = @transform_3, window_bounds = array<i64: 128, 128>}]} {
    %c0 = arith.constant 0 : index
    %c0_0 = arith.constant 0 : index
    %0 = vector.load %arg2[%c0, %c0_0] : memref<128x64xf32, #tpu.memory_space<vmem>>, vector<128x64xf32>
    %c0_1 = arith.constant 0 : index
    %c0_2 = arith.constant 0 : index
    %1 = vector.load %arg3[%c0_1, %c0_2] : memref<64x128xf32, #tpu.memory_space<vmem>>, vector<64x128xf32>
    %cst = arith.constant dense<0.000000e+00> : vector<128x128xf32>
    %2 = tpu.matmul %0, %1, %cst {dimension_numbers = #tpu.dot_dimension_numbers<[1], [0], [0], [1], [0, 0, 1, 1], [], []>} : vector<128x64xf32>, vector<64x128xf32>, vector<128x128xf32> -> vector<128x128xf32>
    %c0_3 = arith.constant 0 : index
    %c0_4 = arith.constant 0 : index
    %3 = vector.load %arg4[%c0_3, %c0_4] : memref<1x128xf32, #tpu.memory_space<vmem>>, vector<1x128xf32>
    %4 = vector.broadcast %3 : vector<1x128xf32> to vector<128x128xf32>
    %5 = arith.addf %2, %4 : vector<128x128xf32>
    %6 = math.sin %5 : vector<128x128xf32>
    %c0_5 = arith.constant 0 : index
    %c0_6 = arith.constant 0 : index
    %7 = vector.load %arg5[%c0_5, %c0_6] : memref<128x128xf32, #tpu.memory_space<vmem>>, vector<128x128xf32>
    tpu.vector_store %arg5[%c0_5, %c0_6], %6 {strides = array<i32>} : memref<128x128xf32, #tpu.memory_space<vmem>>, vector<128x128xf32>,
    return
  }
  func.func @transform_0(%arg0: i32, %arg1: i32) -> (i32, i32) {
    %c0_i32 = arith.constant 0 : i32
    %c0_i32_0 = arith.constant 0 : i32
    return %arg0, %c0_i32 : i32, i32
  }
  func.func @transform_1(%arg0: i32, %arg1: i32) -> (i32, i32) {
    %c0_i32 = arith.constant 0 : i32
    %c0_i32_0 = arith.constant 0 : i32
    %c0_i32_1 = arith.constant 0 : i32
    return %c0_i32, %c0_i32_0 : i32, i32
  }
  func.func @transform_2(%arg0: i32, %arg1: i32) -> (i32, i32) {
    %c0_i32 = arith.constant 0 : i32
    %c0_i32_0 = arith.constant 0 : i32
    %c0_i32_1 = arith.constant 0 : i32
    return %c0_i32, %c0_i32_0 : i32, i32
  }
  func.func @transform_3(%arg0: i32, %arg1: i32) -> (i32, i32) {
    %c0_i32 = arith.constant 0 : i32
    return %arg0, %arg1 : i32, i32
  }
}

</mosaic_0001>

<bundles_post_ra>
// kernel: tpu_custom_call.1
= control target key start
LH: loop header
LB: loop body
LE: loop exit
PB: predicated region body
PF: predicated region fallthrough
CT: control target
= control target key end

     0   :  { %8 = vsyncpa [#allocation3], 0  ;;  %s4208_s0 = inlined_call_operand.vmem [shape: f32[300,64], index: 0, kind: input, shape index: {}]   ;;  %s4209_s1 = inlined_call_operand.vmem [shape: f32[64,128], index: 1, kind: input, shape index: {}]   ;;  %s4210_s2 = inlined_call_operand.vmem [shape: f32[1,128], index: 2, kind: input, shape index: {}]   ;;  %s4211_s3 = inlined_call_operand.hbm [shape: f32[300,128], index: 3, kind: output, shape index: {}]  }
   0x1   :  { %10 = vsyncpa [#allocation3 + $0x1], 0  ;;  %s2696_s12 = smov 0   ;;  %s2698_s13 = smov 0  }
   0x2   :  { %s2700_s14 = smov 0   ;;  %s2702_s15 = smov 0  }
   0x3   :  { %s2704_s16 = smov 0   ;;  %s2706_s17 = smov 0  }
   0x4 LB: > { %s2208_s18 = sadd.s32 4294967295, %s2665_s17   ;;  %s2209_s19 = sadd.s32 4294967294, %s2665_s17   ;;  %s2665_s17 = sphi %s2706_s17, %s16_s17   ;;  %s2661_s16 = sphi %s2704_s16, %s4246_s16   ;;  %s2657_s15 = sphi %s2702_s15, %s4245_s15   ;;  %s2653_s14 = sphi %s2700_s14, %s4244_s14   ;;  %s2649_s13 = sphi %s2698_s13, %s4243_s13   ;;  %s2645_s12 = sphi %s2696_s12, %s4242_s12  }
   0x5   : > { %s28_s20 = sadd.s32 1, %s2661_s16  ;;  %s105_s21 = sadd.s32 1, %s2653_s14 }
   0x6   : > { %p30_p0 = scmp.ge.s32.totalorder %s28_s20, 3  ;;  %p115_p1 = scmp.ne.s32.totalorder %s2653_s14, %s2649_s13 }
   0x7   : > { %p116_p2 = scmp.eq.s32.totalorder %s2208_s18, 2  ;;  %p121_p3 = scmp.ne.s32.totalorder %s2649_s13, %s2645_s12 }
   0x8   : > { %s4248_s20 = smov (%p30_p0, %s28_s20), 0  ;;  %p122_p5 = scmp.eq.s32.totalorder %s2209_s19, 2 }
   0x9   : > { %p2736_p4 = por %p116_p2, %p115_p1  ;;  %s100_s23 = ssub.s32 %s2661_s16, %s4248_s20 }
   0xa   : > { %p2212_p6 = scmp.ge.s32.totalorder %s2665_s17, 1  ;;  %p103_p7 = scmp.eq.s32.totalorder %s100_s23, 0 }
   0xb   : > { %p2743_p8 = por %p122_p5, %p121_p3  ;;  %p163_p9 = scmp.lt.s32.totalorder %s2665_s17, 4 }
   0xc   : > { %s2749_s25 = scalar_select %p103_p7, %s2653_s14, %s105_s21  }
   0xd   : > { %p164_p10 = pnand %p2212_p6, %p163_p9 }
   0xe   : > { %v226_v0 = vld [vmem:[%s4209_s1] sm:$0xff] (!%p164_p10)  ;;  %v227_v1 = vld [vmem:[%s4209_s1 + $0x8] sm:$0xff] (!%p164_p10)  ;;  %v228_v2 = vld [vmem:[%s4209_s1 + $0x10] sm:$0xff] (!%p164_p10)  ;;  %s2761_s5 = sshll.u32 (!%p164_p10), %s2657_s15, 4  ;;  %vm241_vm0 = vcmask (!%p164_p10), 523264   ;;  %s188_s4 = sand.u32 (!%p164_p10), 1, %s2649_s13  }
   0xf   : > { %167 = sbr.rel (%p164_p10) target bundleno = 708 (0x2c4), region = 32  ;;  %v2371_v3 = vpack.c.bf16 (!%p164_p10), %v227_v1, %v226_v0  ;;  %v229_v4 = vld [vmem:[%s4209_s1 + $0x18] sm:$0xff] (!%p164_p10)  ;;  %p196_p11 = scmp.lt.s32.totalorder (!%p164_p10), %s2761_s5, 37  ;;  %v230_v6 = vld [vmem:[%s4209_s1 + $0x20] sm:$0xff] (!%p164_p10)  ;;  %v231_v7 = vld [vmem:[%s4209_s1 + $0x28] sm:$0xff] (!%p164_p10) }
  0x10   : > { %v2375_v5 = vpack.c.bf16 (!%p164_p10), %v229_v4, %v228_v2  ;;  %v2379_v8 = vpack.c.bf16 (!%p164_p10), %v231_v7, %v230_v6  ;;  %v232_v9 = vld [vmem:[%s4209_s1 + $0x30] sm:$0xff] (!%p164_p10)  ;;  %v233_v10 = vld [vmem:[%s4209_s1 + $0x38] sm:$0xff] (!%p164_p10)  ;;  %v2821_v28 = vld [vmem:[%s4210_s2] ss:$0 sm:$0xff] (!%p164_p10)  ;;  %s2213_s8 = sshll.u32 (!%p164_p10), %s188_s4, 7  ;;  %s4142_s21 = scalar_lea.sflag (!%p164_p10), [#allocation3], %s188_s4 }
  0x11   : > { %2372 = vmatprep.subr.bf16.mxu0 (!%p164_p10), %v2371_v3  ;;  %2387 = vmatprep.subr.bf16.mxu1 (!%p164_p10), %v2371_v3  ;;  %v2383_v13 = vpack.c.bf16 (!%p164_p10), %v233_v10, %v232_v9  ;;  %v2668_v9 = vmov (!%p164_p10), 2475754826   ;;  %s3138_s9 = scalar_lea.vmem (!%p164_p10), [#allocation2], %s2213_s8 }
  0x12   : > { %2374 = vmatpush3.bf16.msra.mxu0 (!%p164_p10), %v2371_v3  ;;  %2391 = vmatpush3.bf16.msra.mxu1 (!%p164_p10), %v2371_v3 }
  0x13   : > { %2376 = vmatprep.subr.bf16.mxu0 (!%p164_p10), %v2375_v5  ;;  %2388 = vmatprep.subr.bf16.mxu1 (!%p164_p10), %v2375_v5 }
  0x16   : > { %s197_s18 = scalar_select %p196_p11, %s2761_s5, 37  ;;  %2378 = vmatpush3.bf16.msra.mxu0 %v2375_v5  ;;  %2392 = vmatpush3.bf16.msra.mxu1 %v2375_v5  ;;  %v2667_v5 = vmov 683565275  }
  0x17   : > { %2380 = vmatprep.subr.bf16.mxu0 %v2379_v8  ;;  %2389 = vmatprep.subr.bf16.mxu1 %v2379_v8  ;;  %s2124_s23 = ssub.s32 (%p2736_p4), 38, %s2761_s5 }
  0x18   : > { %s2215_s19 = sshll.u32 %s197_s18, 3  ;;  %p2125_p12 = scmp.lt.s32.totalorder (%p2736_p4), %s2124_s23, 16 }
  0x19   : > { %s2783_s30 = scalar_lea.vmem %s4208_s0, %s2215_s19 }
  0x1a   : > { %v210_v11 = vld [vmem:[%s2783_s30] sm:$0xff]  ;;  %2382 = vmatpush3.bf16.msra.mxu0 %v2379_v8  ;;  %2393 = vmatpush3.bf16.msra.mxu1 %v2379_v8  ;;  %v211_v14 = vld [vmem:[%s2783_s30 + $0x8] sm:$0xff]  ;;  %v212_v16 = vld [vmem:[%s2783_s30 + $0x10] sm:$0xff] }
  0x1b   : > { %v218_v12 = vld [vmem:[%s2783_s30 + $0x40] sm:$0xff]  ;;  %2347 = vmatprep.mubr.msk.f32.mxu0 %vm241_vm0, %v210_v11  ;;  %2384 = vmatprep.subr.bf16.mxu0 %v2383_v13  ;;  %v219_v15 = vld [vmem:[%s2783_s30 + $0x48] sm:$0xff]  ;;  %v220_v17 = vld [vmem:[%s2783_s30 + $0x50] sm:$0xff]  ;;  %v2669_v11 = vmov 2131351028  }
  0x1c   : > { %2359 = vmatprep.mubr.msk.f32.mxu1 %vm241_vm0, %v218_v12  ;;  %2390 = vmatprep.subr.bf16.mxu1 %v2383_v13  ;;  %v213_v18 = vld [vmem:[%s2783_s30 + $0x18] sm:$0xff]  ;;  %v214_v20 = vld [vmem:[%s2783_s30 + $0x20] sm:$0xff]  ;;  %v215_v22 = vld [vmem:[%s2783_s30 + $0x28] sm:$0xff] }
  0x1d   : > { %v221_v19 = vld [vmem:[%s2783_s30 + $0x58] sm:$0xff]  ;;  %v222_v21 = vld [vmem:[%s2783_s30 + $0x60] sm:$0xff]  ;;  %v223_v23 = vld [vmem:[%s2783_s30 + $0x68] sm:$0xff] }
  0x1e   : > { %2386 = vmatpush3.bf16.msra.mxu0 %v2383_v13  ;;  %2394 = vmatpush3.bf16.msra.mxu1 %v2383_v13  ;;  %v216_v24 = vld [vmem:[%s2783_s30 + $0x30] sm:$0xff]  ;;  %v217_v26 = vld [vmem:[%s2783_s30 + $0x38] sm:$0xff]  ;;  %v2670_v13 = vmov 2102212464  }
  0x1f   : > { %v224_v25 = vld [vmem:[%s2783_s30 + $0x70] sm:$0xff]  ;;  %v225_v27 = vld [vmem:[%s2783_s30 + $0x78] sm:$0xff] }
  0x21   : > { %2348 = vmatmul.mubr.msk.f32.vlgmr.msra.gmra.mrb[0].mxu0 %vm241_vm0, %v211_v14  ;;  %2360 = vmatmul.mubr.msk.f32.vlgmr.msra.gmra.mrb[0].mxu1 %vm241_vm0, %v219_v15  ;;  %v2671_v15 = vmov 920167782  }
  0x22   : > { %2350 = vmatprep.mubr.msk.f32.mxu0 %vm241_vm0, %v212_v16  ;;  %2362 = vmatprep.mubr.msk.f32.mxu1 %vm241_vm0, %v220_v17 }
  0x25   : > { %2351 = vmatmul.mubr.msk.f32.gmra.mrb[2].mxu0 %vm241_vm0, %v213_v18  ;;  %2363 = vmatmul.mubr.msk.f32.gmra.mrb[2].mxu1 %vm241_vm0, %v221_v19 }
  0x26   : > { %2353 = vmatprep.mubr.msk.f32.mxu0 %vm241_vm0, %v214_v20  ;;  %2365 = vmatprep.mubr.msk.f32.mxu1 %vm241_vm0, %v222_v21 }
  0x29   : > { %2354 = vmatmul.mubr.msk.f32.gmra.mrb[4].mxu0 %vm241_vm0, %v215_v22  ;;  %2366 = vmatmul.mubr.msk.f32.gmra.mrb[4].mxu1 %vm241_vm0, %v223_v23  ;;  %v2672_v22 = vmov 1326507024  }
  0x2a   : > { %2356 = vmatprep.mubr.msk.f32.mxu0 %vm241_vm0, %v216_v24  ;;  %2368 = vmatprep.mubr.msk.f32.mxu1 %vm241_vm0, %v224_v25 }
  0x2d   : > { %2357 = vmatmul.mubr.msk.f32.gmra.mrb[6].mxu0 %vm241_vm0, %v217_v26  ;;  %2369 = vmatmul.mubr.msk.f32.gmra.mrb[6].mxu1 %vm241_vm0, %v225_v27 }
  0xf4   : > { %v2349_v29 = vpop.f32.mrb[0].mxu0  ;;  %v2361_v30 = vpop.f32.mrb[0].mxu1 }
  0xf5   : > { %v2824_v31 = vadd.f32 %v2349_v29, %v2821_v28  ;;  %v2827_v32 = vadd.f32 %v2361_v30, %v2821_v28  ;;  %v356_v33 = vpop.f32.mrb[1].mxu0  ;;  %v396_v34 = vpop.f32.mrb[1].mxu1 }
  0xf6   : > { %v2830_v35 = vadd.f32 %v2821_v28, %v356_v33  ;;  %v2848_v53 = vadd.f32 %v2821_v28, %v396_v34 }
  0xf7   : > { %v539_v36 = vand.u32 2147483647, %v2824_v31  ;;  %v542_v37 = vand.u32 2139095040, %v2824_v31  ;;  %v1371_v38 = vand.u32 2147483647, %v2827_v32  ;;  %v1374_v39 = vand.u32 2139095040, %v2827_v32 }
  0xf8   : > { %v2836_v40 = vpop.f32.mrb[2].mxu0  ;;  %v2838_v41 = vpop.f32.mrb[2].mxu1  ;;  %v438_v46 = vand.u32 2139095040, %v2830_v35  ;;  %v435_v56 = vand.u32 2147483647, %v2830_v35  ;;  %v1270_v3 = vand.u32 2139095040, %v2848_v53 }
  0xf9   : > { %v543_v42 = vshrl.u32 %v542_v37, 23  ;;  %v546_v43 = vand.u32 8388607, %v539_v36  ;;  %v1375_v44 = vshrl.u32 %v1374_v39, 23  ;;  %v1378_v45 = vand.u32 8388607, %v1371_v38 }
  0xfa   : > { %v2845_v48 = vpop.f32.mrb[3].mxu0  ;;  %v439_v50 = vshrl.u32 %v438_v46, 23  ;;  %v2851_v58 = vpop.f32.mrb[3].mxu1  ;;  %v2859_v1 = vand.u32 8388607, %v435_v56  ;;  %vm541_vm14 = vcmp.lt.s32.totalorder %v2824_v31, 0 }
  0xfb   : > { %v2237_v47 = vadd.s32 4294967169, %v543_v42  ;;  %v2269_v49 = vadd.s32 4294967169, %v1375_v44  ;;  %v547_v51 = vor.u32 8388608, %v546_v43  ;;  %v1379_v54 = vor.u32 8388608, %v1378_v45 }
  0xfc   : > { %v2233_v57 = vadd.s32 4294967169, %v439_v50  ;;  %vm2951_vm15 = vcmp.le.f32.partialorder %v539_v36, 0.7853982 }
  0xfd   : > { %v549_v52 = vadd.s32 1, %v2237_v47  ;;  %v1381_v55 = vadd.s32 1, %v2269_v49  ;;  %v2853_v62 = vshll.u32 %v547_v51, 8  ;;  %v2855_v0 = vshll.u32 %v1379_v54, 8 }
  0xfe   : > { %v2861_v2 = vadd.s32 1, %v2233_v57 }
  0xff   : > { %vm550_vm1 = vcmp.gt.s32.totalorder %v549_v52, 0  ;;  %vm1382_vm2 = vcmp.gt.s32.totalorder %v1381_v55, 0 }
 0x100   : > { %v551_v59 = vsel %vm550_vm1, %v549_v52, 0  ;;  %v1383_v63 = vsel %vm1382_vm2, %v1381_v55, 0  ;;  %vm446_vm7 = vcmp.gt.s32.totalorder %v2861_v2, 0 }
 0x101   : > { %v552_v60 = vshrl.u32 %v551_v59, 5  ;;  %v553_v61 = vand.u32 31, %v551_v59  ;;  %v2865_v7 = vshrl.u32 %v1383_v63, 5  ;;  %v1385_v8 = vand.u32 31, %v1383_v63 }
 0x103   : > { %v554_v4 = vsub.s32 32, %v553_v61  ;;  %v556_v6 = vshll.u32 %v2667_v5, %v553_v61  ;;  %v559_v10 = vshll.u32 %v2668_v9, %v553_v61  ;;  %v562_v12 = vshll.u32 %v2669_v11, %v553_v61 }
 0x104   : > { %v565_v14 = vshll.u32 %v2670_v13, %v553_v61  ;;  %v568_v16 = vshll.u32 %v2671_v15, %v553_v61  ;;  %vm571_vm3 = vcmp.lt.s32.totalorder %v552_v60, 1  ;;  %vm572_vm4 = vcmp.lt.s32.totalorder %v552_v60, 2 }
 0x105   : > { %v557_v17 = vshrl.u32 %v2668_v9, %v554_v4  ;;  %v560_v18 = vshrl.u32 %v2669_v11, %v554_v4  ;;  %v563_v19 = vshrl.u32 %v2670_v13, %v554_v4  ;;  %v555_v20 = vshrl.u32 %v2667_v5, %v554_v4 }
 0x106   : > { %v566_v21 = vshrl.u32 %v2671_v15, %v554_v4  ;;  %v569_v23 = vshrl.u32 %v2672_v22, %v554_v4  ;;  %v1386_v27 = vsub.s32 32, %v1385_v8  ;;  %vm573_vm5 = vcmp.lt.s32.totalorder %v552_v60, 3 }
 0x107   : > { %v558_v24 = vor.u32 %v557_v17, %v556_v6  ;;  %v561_v25 = vor.u32 %v560_v18, %v559_v10  ;;  %v564_v26 = vor.u32 %v563_v19, %v562_v12  ;;  %vm574_vm6 = vcmp.lt.s32.totalorder %v552_v60, 4 }
 0x108   : > { %v567_v29 = vor.u32 %v566_v21, %v565_v14  ;;  %v570_v30 = vor.u32 %v569_v23, %v568_v16  ;;  %v1388_v45 = vshll.u32 %v2667_v5, %v1385_v8  ;;  %v1389_v49 = vshrl.u32 %v2668_v9, %v1386_v27 }
 0x109   : > { %v575_v33 = vsel %vm571_vm3, %v555_v20, %v558_v24  ;;  %v576_v34 = vsel %vm574_vm6, %v564_v26, 2102212464  ;;  %v579_v37 = vsel %vm571_vm3, %v558_v24, %v561_v25  ;;  %v583_v39 = vsel %vm571_vm3, %v561_v25, %v564_v26 }
 0x10a   : > { %v577_v42 = vsel %vm573_vm5, %v561_v25, %v576_v34  ;;  %v580_v43 = vsel %vm574_vm6, %v567_v29, 920167782  ;;  %v584_v44 = vsel %vm574_vm6, %v570_v30, 1326507024  ;;  %v1391_v50 = vshll.u32 %v2668_v9, %v1385_v8 }
 0x10b   : > { %v581_v46 = vsel %vm573_vm5, %v564_v26, %v580_v43  ;;  %v585_v47 = vsel %vm573_vm5, %v567_v29, %v584_v44  ;;  %v578_v51 = vsel %vm572_vm4, %v575_v33, %v577_v42  ;;  %v1392_v55 = vshrl.u32 %v2669_v11, %v1386_v27 }
 0x10c   : > { %v582_v52 = vsel %vm572_vm4, %v579_v37, %v581_v46  ;;  %v586_v54 = vsel %vm572_vm4, %v583_v39, %v585_v47  ;;  %v1390_v4 = vor.u32 %v1389_v49, %v1388_v45  ;;  %v1394_v10 = vshll.u32 %v2669_v11, %v1385_v8 }
 0x10d   : > { %v2889_v57 = vmul.u32.u64.low %v2853_v62, %v586_v54  ;;  %v2890_v59 = vmul.u32.u64.high %v2853_v62, %v586_v54, %v2889_v57  ;;  %v2893_v61 = vmul.u32.u64.low %v2853_v62, %v582_v52  ;;  %v2894_v63 = vmul.u32.u64.high %v2853_v62, %v582_v52, %v2893_v61 }
 0x10e   : > { %v1393_v6 = vor.u32 %v1392_v55, %v1391_v50  ;;  %v1395_v12 = vshrl.u32 %v2670_v13, %v1386_v27  ;;  %v1387_v14 = vshrl.u32 %v2667_v5, %v1386_v27  ;;  %v1397_v60 = vshll.u32 %v2670_v13, %v1385_v8 }
 0x10f   : > { %v1398_v16 = vshrl.u32 %v2671_v15, %v1386_v27  ;;  %v1401_v17 = vshrl.u32 %v2672_v22, %v1386_v27  ;;  %v594_v18 = vmul.u32 %v2853_v62, %v578_v51  ;;  %v1400_v20 = vshll.u32 %v2671_v15, %v1385_v8 }
 0x110   : > { %v1396_v19 = vor.u32 %v1395_v12, %v1394_v10  ;;  %vm1403_vm8 = vcmp.lt.s32.totalorder %v2865_v7, 1  ;;  %vm596_vm9 = vc.u32 %v2890_v59, %v2893_v61  ;;  %v597_v21 = vadd.s32 1, %v2894_v63  ;;  %v2934_v10 = vpop.f32.mrb[4].mxu0 }
 0x111   : > { %v1399_v23 = vor.u32 %v1398_v16, %v1397_v60  ;;  %vm1404_vm10 = vcmp.lt.s32.totalorder %v2865_v7, 2  ;;  %v1402_v24 = vor.u32 %v1401_v17, %v1400_v20  ;;  %vm1405_vm11 = vcmp.lt.s32.totalorder %v2865_v7, 3 }
 0x112   : > { %vm1406_vm12 = vcmp.lt.s32.totalorder %v2865_v7, 4  ;;  %v1411_v25 = vsel %vm1403_vm8, %v1390_v4, %v1393_v6  ;;  %v598_v62 = vsel %vm596_vm9, %v597_v21, %v2894_v63  ;;  %v1415_v8 = vsel %vm1403_vm8, %v1393_v6, %v1396_v19 }
 0x113   : > { %v1408_v26 = vsel %vm1406_vm12, %v1396_v19, 2102212464  ;;  %v1412_v27 = vsel %vm1406_vm12, %v1399_v23, 920167782  ;;  %v599_v29 = vadd.s32 %v598_v62, %v594_v18  ;;  %v1407_v30 = vsel %vm1403_vm8, %v1387_v14, %v1390_v4 }
 0x114   : > { %v1413_v33 = vsel %vm1405_vm11, %v1396_v19, %v1412_v27  ;;  %v1416_v34 = vsel %vm1406_vm12, %v1402_v24, 1326507024  ;;  %v1409_v37 = vsel %vm1405_vm11, %v1393_v6, %v1408_v26  ;;  %v447_v43 = vsel %vm446_vm7, %v2861_v2, 0 }
 0x115   : > { %v1414_v39 = vsel %vm1404_vm10, %v1411_v25, %v1413_v33  ;;  %v1417_v42 = vsel %vm1405_vm11, %v1399_v23, %v1416_v34  ;;  %v600_v44 = vadd.s32 536870912, %v599_v29  ;;  %v1267_v51 = vand.u32 2147483647, %v2848_v53 }
 0x116   : > { %v1418_v45 = vsel %vm1404_vm10, %v1415_v8, %v1417_v42  ;;  %v2919_v46 = vmul.u32.u64.low %v2855_v0, %v1414_v39  ;;  %v2920_v47 = vmul.u32.u64.high %v2855_v0, %v1414_v39, %v2919_v46  ;;  %v1410_v54 = vsel %vm1404_vm10, %v1407_v30, %v1409_v37 }
 0x117   : > { %v2924_v49 = vmul.u32.u64.low %v2855_v0, %v1418_v45  ;;  %v2925_v50 = vmul.u32.u64.high %v2855_v0, %v1418_v45, %v2924_v49  ;;  %v601_v52 = vshrl.u32 %v600_v44, 30  ;;  %v443_v2 = vor.u32 8388608, %v2859_v1 }
 0x118   : > { %v449_v55 = vand.u32 31, %v447_v43  ;;  %v1429_v63 = vadd.s32 1, %v2920_v47  ;;  %v1271_v6 = vshrl.u32 %v1270_v3, 23  ;;  %v1426_v12 = vmul.u32 %v2855_v0, %v1410_v54 }
 0x119   : > { %v602_v57 = vshll.u32 %v601_v52, 30  ;;  %vm1428_vm13 = vc.u32 %v2925_v50, %v2919_v46  ;;  %v2941_v7 = vand.u32 8388607, %v1267_v51  ;;  %v2947_v60 = vshll.u32 %v443_v2, 8 }
 0x11a   : > { %v450_v4 = vsub.s32 32, %v449_v55  ;;  %v1430_v14 = vsel %vm1428_vm13, %v1429_v63, %v2920_v47  ;;  %v595_v0 = vadd.s32 %v2893_v61, %v2890_v59  ;;  %v2956_v17 = vshrl.u32 %v447_v43, 5 }
 0x11b   : > { %v2944_v1 = vsub.s32 %v599_v29, %v602_v57  ;;  %v1431_v16 = vadd.s32 %v1430_v14, %v1426_v12  ;;  %v2265_v23 = vadd.s32 4294967169, %v1271_v6  ;;  %v625_v24 = vsub.s32 4, %v601_v52 }
 0x11c   : > { %v453_v18 = vshrl.u32 %v2668_v9, %v450_v4  ;;  %v456_v20 = vshrl.u32 %v2669_v11, %v450_v4  ;;  %v459_v21 = vshrl.u32 %v2670_v13, %v450_v4  ;;  %v452_v36 = vshll.u32 %v2667_v5, %v449_v55 }
 0x11d   : > { %v605_v19 = vsub.s32 0, %v2944_v1  ;;  %v1432_v25 = vadd.s32 536870912, %v1431_v16  ;;  %v1275_v62 = vor.u32 8388608, %v2941_v7  ;;  %v455_v61 = vshll.u32 %v2668_v9, %v449_v55 }
 0x11e   : > { %v458_v26 = vshll.u32 %v2669_v11, %v449_v55  ;;  %v462_v27 = vshrl.u32 %v2671_v15, %v450_v4  ;;  %v454_v29 = vor.u32 %v453_v18, %v452_v36  ;;  %v461_v30 = vshll.u32 %v2670_v13, %v449_v55 }
 0x11f   : > { %v2238_v59 = vmin.u32 %v605_v19, %v2944_v1  ;;  %v1433_v8 = vshrl.u32 %v1432_v25, 30  ;;  %v465_v33 = vshrl.u32 %v2672_v22, %v450_v4  ;;  %v457_v37 = vor.u32 %v456_v20, %v455_v61 }
 0x120   : > { %v460_v39 = vor.u32 %v459_v21, %v458_v26  ;;  %v464_v42 = vshll.u32 %v2671_v15, %v449_v55  ;;  %v626_v43 = vsel %vm541_vm14, %v625_v24, %v601_v52  ;;  %v463_v45 = vor.u32 %v462_v27, %v461_v30 }
 0x121   : > { %v607_v34 = vclz %v2238_v59  ;;  %v1434_v44 = vshll.u32 %v1433_v8, 30  ;;  %vm467_vm0 = vcmp.lt.s32.totalorder %v2956_v17, 1  ;;  %vm468_vm1 = vcmp.lt.s32.totalorder %v2956_v17, 2 }
 0x122   : > { %v466_v49 = vor.u32 %v465_v33, %v464_v42  ;;  %vm470_vm2 = vcmp.lt.s32.totalorder %v2956_v17, 4  ;;  %vm1373_vm3 = vcmp.lt.s32.totalorder %v2827_v32, 0  ;;  %v451_v2 = vshrl.u32 %v2667_v5, %v450_v4 }
 0x123   : > { %v2239_v47 = vadd.s32 4294967294, %v607_v34  ;;  %v2977_v54 = vsub.s32 %v1431_v16, %v1434_v44  ;;  %vm469_vm4 = vcmp.lt.s32.totalorder %v2956_v17, 3  ;;  %v476_v52 = vsel %vm470_vm2, %v463_v45, 920167782 }
 0x124   : > { %v628_v55 = vsel %vm2951_vm15, 0, %v626_v43  ;;  %v475_v57 = vsel %vm467_vm0, %v454_v29, %v457_v37  ;;  %v477_v63 = vsel %vm469_vm4, %v460_v39, %v476_v52  ;;  %v1457_v14 = vsub.s32 4, %v1433_v8 }
 0x125   : > { %vm2240_vm5 = vcmp.lt.s32.totalorder %v2239_v47, 0  ;;  %v1437_v12 = vsub.s32 0, %v2977_v54  ;;  %v479_v4 = vsel %vm467_vm0, %v457_v37, %v460_v39  ;;  %vm2994_vm6 = vcmp.le.f32.partialorder %v1371_v38, 0.7853982 }
 0x126   : > { %v610_v6 = vsel %vm2240_vm5, 0, %v2239_v47  ;;  %v472_v20 = vsel %vm470_vm2, %v460_v39, 2102212464  ;;  %v480_v21 = vsel %vm470_vm2, %v466_v49, 1326507024  ;;  %v478_v36 = vsel %vm468_vm1, %v475_v57, %v477_v63  ;;  %v3014_v39 = vpop.f32.mrb[4].mxu1 }
 0x127   : > { %v611_v16 = vsub.s32 32, %v610_v6  ;;  %v615_v18 = vsub.s32 4294967266, %v610_v6  ;;  %v612_v24 = vshll.u32 %v2944_v1, %v610_v6  ;;  %v2270_v25 = vmin.u32 %v1437_v12, %v2977_v54 }
 0x128   : > { %v481_v59 = vsel %vm469_vm4, %v463_v45, %v480_v21  ;;  %v1277_v27 = vadd.s32 1, %v2265_v23  ;;  %v632_v30 = vadd.s32 3, %v628_v55  ;;  %v471_v34 = vsel %vm467_vm0, %v451_v2, %v454_v29 }
 0x129   : > { %v613_v38 = vshrl.u32 %v595_v0, %v611_v16  ;;  %v616_v61 = vadd.s32 127, %v615_v18  ;;  %v482_v26 = vsel %vm468_vm1, %v479_v4, %v481_v59  ;;  %v1439_v33 = vclz %v2270_v25 }
 0x12a   : > { %v473_v1 = vsel %vm469_vm4, %v457_v37, %v472_v20  ;;  %v3017_v44 = vmul.u32.u64.low %v2947_v60, %v482_v26  ;;  %v3018_v0 = vmul.u32.u64.high %v2947_v60, %v482_v26, %v3017_v44  ;;  %vm1278_vm7 = vcmp.gt.s32.totalorder %v1277_v27, 0 }
 0x12b   : > { %v614_v42 = vor.u32 %v613_v38, %v612_v24  ;;  %v617_v43 = vshll.u32 %v616_v61, 23  ;;  %v2271_v45 = vadd.s32 4294967294, %v1439_v33  ;;  %v1427_v29 = vadd.s32 %v2919_v46, %v2925_v50 }
 0x12c   : > { %v3021_v47 = vmul.u32.u64.low %v2947_v60, %v478_v36  ;;  %v3022_v23 = vmul.u32.u64.high %v2947_v60, %v478_v36, %v3021_v47  ;;  %v1458_v37 = vsel %vm1373_vm3, %v1457_v14, %v1433_v8  ;;  %v1279_v2 = vsel %vm1278_vm7, %v1277_v27, 0 }
 0x12d   : > { %v618_v49 = vor.u32 4788187, %v617_v43  ;;  %v3029_v52 = vand.u32 3, %v632_v30  ;;  %vm2272_vm8 = vcmp.lt.s32.totalorder %v2271_v45, 0  ;;  %v474_v55 = vsel %vm468_vm1, %v471_v34, %v473_v1 }
 0x12e   : > { %v1281_v57 = vand.u32 31, %v1279_v2  ;;  %v621_v6 = vcvt.s32.f32 %v614_v42  ;;  %v1442_v12 = vsel %vm2272_vm8, 0, %v2271_v45  ;;  %vm492_vm9 = vc.u32 %v3018_v0, %v3021_v47 }
 0x12f   : > { %v619_v63 = vand.u32 2147483647, %v618_v49  ;;  %v1443_v4 = vsub.s32 32, %v1442_v12  ;;  %v1447_v16 = vsub.s32 4294967266, %v1442_v12  ;;  %v1460_v46 = vsel %vm2994_vm6, 0, %v1458_v37 }
 0x130   : > { %v493_v50 = vadd.s32 1, %v3022_v23  ;;  %v490_v14 = vmul.u32 %v2947_v60, %v474_v55  ;;  %v3039_v18 = vshrl.u32 %v1279_v2, 5  ;;  %v1282_v17 = vsub.s32 32, %v1281_v57 }
 0x131   : > { %v622_v8 = vmul.f32 %v621_v6, %v619_v63  ;;  %v1444_v20 = vshll.u32 %v2977_v54, %v1442_v12  ;;  %v1445_v21 = vshrl.u32 %v1427_v29, %v1443_v4  ;;  %v1448_v24 = vadd.s32 127, %v1447_v16 }
 0x132   : > { %v494_v25 = vsel %vm492_vm9, %v493_v50, %v3022_v23  ;;  %v1284_v38 = vshll.u32 %v2667_v5, %v1281_v57  ;;  %v1285_v61 = vshrl.u32 %v2668_v9, %v1282_v17  ;;  %v1287_v30 = vshll.u32 %v2668_v9, %v1281_v57 }
 0x133   : > { %v623_v36 = vxor.u32 2147483648, %v622_v8  ;;  %v495_v59 = vadd.s32 %v494_v25, %v490_v14  ;;  %v1446_v26 = vor.u32 %v1445_v21, %v1444_v20  ;;  %v1449_v27 = vshll.u32 %v1448_v24, 23 }
 0x134   : > { %v1288_v60 = vshrl.u32 %v2669_v11, %v1282_v17  ;;  %v1290_v34 = vshll.u32 %v2669_v11, %v1281_v57  ;;  %v1291_v1 = vshrl.u32 %v2670_v13, %v1282_v17  ;;  %v1286_v44 = vor.u32 %v1285_v61, %v1284_v38 }
 0x135   : > { %v624_v33 = vsel %vm541_vm14, %v623_v36, %v622_v8  ;;  %v496_v54 = vadd.s32 536870912, %v495_v59  ;;  %v1450_v43 = vor.u32 4788187, %v1449_v27  ;;  %v1293_v45 = vshll.u32 %v2670_v13, %v1281_v57 }
 0x136   : > { %v627_v42 = vsel %vm2951_vm15, %v2824_v31, %v624_v33  ;;  %v1453_v23 = vcvt.s32.f32 %v1446_v26  ;;  %v1294_v29 = vshrl.u32 %v2671_v15, %v1282_v17  ;;  %v1289_v2 = vor.u32 %v1288_v60, %v1287_v30 }
 0x137   : > { %2521 = vcosq.f32 %v627_v42  ;;  %v3055_v49 = vshrl.u32 %v496_v54, 30  ;;  %v1451_v37 = vand.u32 2147483647, %v1450_v43  ;;  %v1297_v55 = vshrl.u32 %v2672_v22, %v1282_v17 }
 0x138   : > { %2523 = vsinq.f32 %v627_v42  ;;  %v1295_v6 = vor.u32 %v1294_v29, %v1293_v45  ;;  %v1292_v12 = vor.u32 %v1291_v1, %v1290_v34  ;;  %v1296_v4 = vshll.u32 %v2671_v15, %v1281_v57 }
 0x139   : > { %v498_v63 = vshll.u32 %v3055_v49, 30  ;;  %v1454_v3 = vmul.f32 %v1453_v23, %v1451_v37  ;;  %v1464_v16 = vadd.s32 3, %v1460_v46  ;;  %vm1299_vm10 = vcmp.lt.s32.totalorder %v3039_v18, 1 }
 0x13a   : > { %v3066_v8 = vshll.u32 %v1275_v62, 8  ;;  %vm635_vm11 = vcmp.eq.s32.totalorder %v3029_v52, 0  ;;  %v1298_v20 = vor.u32 %v1297_v55, %v1296_v4  ;;  %vm1302_vm12 = vcmp.lt.s32.totalorder %v3039_v18, 4 }
 0x13b   : > { %v3061_v50 = vsub.s32 %v495_v59, %v498_v63  ;;  %v1455_v14 = vxor.u32 2147483648, %v1454_v3  ;;  %v1307_v21 = vsel %vm1299_vm10, %v1286_v44, %v1289_v2  ;;  %vm634_vm13 = vcmp.lt.s32.totalorder %v3029_v52, 2 }
 0x13c   : > { %v1283_v46 = vshrl.u32 %v2667_v5, %v1282_v17  ;;  %vm1301_vm14 = vcmp.lt.s32.totalorder %v3039_v18, 3  ;;  %v1308_v7 = vsel %vm1302_vm12, %v1295_v6, 920167782  ;;  %vm631_vm15 = vweird.f32 %v2824_v31 }
 0x13d   : > { %v501_v57 = vsub.s32 0, %v3061_v50  ;;  %v1456_v62 = vsel %vm1373_vm3, %v1455_v14, %v1454_v3  ;;  %vm437_vm0 = vcmp.lt.s32.totalorder %v2830_v35, 0  ;;  %vm1300_vm1 = vcmp.lt.s32.totalorder %v3039_v18, 2 }
 0x13e   : > { %v1304_v24 = vsel %vm1302_vm12, %v1292_v12, 2102212464  ;;  %v1309_v17 = vsel %vm1301_vm14, %v1292_v12, %v1308_v7  ;;  %v1459_v25 = vsel %vm2994_vm6, %v2827_v32, %v1456_v62  ;;  %v1311_v38 = vsel %vm1299_vm10, %v1289_v2, %v1292_v12  ;;  %v3147_v62 = vpop.f32.mrb[5].mxu0 }
 0x13f   : > { %v2234_v36 = vmin.u32 %v501_v57, %v3061_v50  ;;  %v1310_v59 = vsel %vm1300_vm1, %v1307_v21, %v1309_v17  ;;  %2525 = vcosq.f32 %v1459_v25  ;;  %v1312_v61 = vsel %vm1302_vm12, %v1298_v20, 1326507024 }
 0x140   : > { %v3098_v26 = vmul.u32.u64.low %v3066_v8, %v1310_v59  ;;  %v3099_v27 = vmul.u32.u64.high %v3066_v8, %v1310_v59, %v3098_v26  ;;  %vm638_vm2 = vcmp.eq.s32.totalorder %v3029_v52, 2  ;;  %2527 = vsinq.f32 %v1459_v25 }
 0x141   : > { %v2522_v30 = vpop.eup %2521  ;;  %v503_v19 = vclz %v2234_v36  ;;  %v521_v60 = vsub.s32 4, %v3055_v49  ;;  %v1303_v34 = vsel %vm1299_vm10, %v1283_v46, %v1286_v44  ;;  %v1305_v1 = vsel %vm1301_vm14, %v1289_v2, %v1304_v24 }
 0x142   : > { %v2524_v33 = vpop.eup %2523  ;;  %v639_v54 = vxor.u32 2147483648, %v2522_v30  ;;  %v1313_v42 = vsel %vm1301_vm14, %v1295_v6, %v1312_v61  ;;  %v3116_v29 = vadd.f32 %v2836_v40, %v2821_v28  ;;  %v1465_v55 = vand.u32 3, %v1464_v16 }
 0x143   : > { %v636_v43 = vxor.u32 2147483648, %v2524_v33  ;;  %v2235_v45 = vadd.s32 4294967294, %v503_v19  ;;  %v1314_v23 = vsel %vm1300_vm1, %v1311_v38, %v1313_v42  ;;  %v1306_v6 = vsel %vm1300_vm1, %v1303_v34, %v1305_v1 }
 0x144   : > { %v640_v37 = vsel %vm638_vm2, %v639_v54, %v2524_v33  ;;  %v3119_v63 = vmul.u32.u64.low %v3066_v8, %v1314_v23  ;;  %v3120_v44 = vmul.u32.u64.high %v3066_v8, %v1314_v23, %v3119_v63  ;;  %v1325_v3 = vadd.s32 1, %v3099_v27 }
 0x145   : > { %v637_v2 = vsel %vm635_vm11, %v2522_v30, %v636_v43  ;;  %vm2236_vm3 = vcmp.lt.s32.totalorder %v2235_v45, 0  ;;  %v491_v40 = vadd.s32 %v3021_v47, %v3018_v0  ;;  %v750_v16 = vand.u32 2139095040, %v3116_v29 }
 0x146   : > { %v641_v12 = vsel %vm634_vm13, %v637_v2, %v640_v37  ;;  %v506_v4 = vsel %vm2236_vm3, 0, %v2235_v45  ;;  %vm1463_vm4 = vweird.f32 %v2827_v32  ;;  %v522_v18 = vsel %vm437_vm0, %v521_v60, %v3055_v49 }
 0x147   : > { %v642_v14 = vsel %vm631_vm15, nan, %v641_v12  ;;  %v507_v20 = vsub.s32 32, %v506_v4  ;;  %v511_v21 = vsub.s32 4294967266, %v506_v4  ;;  %v1322_v0 = vmul.u32 %v3066_v8, %v1306_v6 }
 0x148   : > { %2100 = vst [vmem:[%s3138_s9 + $0x8] sm:$0xff] %v642_v14  ;;  %vm1324_vm5 = vc.u32 %v3120_v44, %v3098_v26  ;;  %v747_v31 = vand.u32 2147483647, %v3116_v29  ;;  %v751_v47 = vshrl.u32 %v750_v16, 23  ;;  %v508_v52 = vshll.u32 %v3061_v50, %v506_v4 }
 0x149   : > { %v509_v57 = vshrl.u32 %v491_v40, %v507_v20  ;;  %v512_v46 = vadd.s32 127, %v511_v21  ;;  %v1326_v7 = vsel %vm1324_vm5, %v1325_v3, %v3099_v27  ;;  %v2526_v49 = vpop.eup %2525  ;;  %vm1470_vm6 = vcmp.eq.s32.totalorder %v1465_v55, 2 }
 0x14a   : > { %vm3151_vm7 = vcmp.le.f32.partialorder %v435_v56, 0.7853982  ;;  %v1327_v24 = vadd.s32 %v1326_v7, %v1322_v0  ;;  %v2245_v17 = vadd.s32 4294967169, %v751_v47  ;;  %v2528_v25 = vpop.eup %2527  ;;  %v1471_v36 = vxor.u32 2147483648, %v2526_v49 }
 0x14b   : > { %v510_v59 = vor.u32 %v509_v57, %v508_v52  ;;  %v513_v50 = vshll.u32 %v512_v46, 23  ;;  %v524_v38 = vsel %vm3151_vm7, 0, %v522_v18  ;;  %v1468_v61 = vxor.u32 2147483648, %v2528_v25 }
 0x14c   : > { %v1328_v27 = vadd.s32 536870912, %v1327_v24  ;;  %v754_v30 = vand.u32 8388607, %v747_v31  ;;  %v757_v19 = vadd.s32 1, %v2245_v17  ;;  %vm1466_vm8 = vcmp.lt.s32.totalorder %v1465_v55, 2 }
 0x14d   : > { %vm1467_vm9 = vcmp.eq.s32.totalorder %v1465_v55, 0  ;;  %v1472_v56 = vsel %vm1470_vm6, %v1471_v36, %v2528_v25  ;;  %v514_v60 = vor.u32 4788187, %v513_v50  ;;  %v528_v54 = vadd.s32 3, %v524_v38 }
 0x14e   : > { %v1469_v33 = vsel %vm1467_vm9, %v2526_v49, %v1468_v61  ;;  %v3159_v34 = vshrl.u32 %v1328_v27, 30  ;;  %vm758_vm10 = vcmp.gt.s32.totalorder %v757_v19, 0  ;;  %v517_v43 = vcvt.s32.f32 %v510_v59 }
 0x14f   : > { %v1473_v1 = vsel %vm1466_vm8, %v1469_v33, %v1472_v56  ;;  %v515_v42 = vand.u32 2147483647, %v514_v60  ;;  %v759_v45 = vsel %vm758_vm10, %v757_v19, 0  ;;  %v755_v63 = vor.u32 8388608, %v754_v30  ;;  %v3214_v56 = vpop.f32.mrb[5].mxu1 }
 0x150   : > { %v1474_v23 = vsel %vm1463_vm4, nan, %v1473_v1  ;;  %v1330_v37 = vshll.u32 %v3159_v34, 30  ;;  %v761_v55 = vand.u32 31, %v759_v45  ;;  %v3165_v6 = vand.u32 3, %v528_v54 }
 0x151   : > { %2108 = vst [vmem:[%s3138_s9 + $0x48] sm:$0xff] %v1474_v23  ;;  %v518_v2 = vmul.f32 %v517_v43, %v515_v42  ;;  %v1323_v40 = vadd.s32 %v3098_v26, %v3120_v44  ;;  %v3173_v16 = vadd.f32 %v2838_v41, %v2821_v28  ;;  %v3176_v14 = vshrl.u32 %v759_v45, 5 }
 0x152   : > { %v3167_v3 = vsub.s32 %v1327_v24, %v1330_v37  ;;  %v762_v4 = vsub.s32 32, %v761_v55  ;;  %v3178_v20 = vshll.u32 %v755_v63, 8  ;;  %v3182_v21 = vadd.f32 %v2821_v28, %v2845_v48 }
 0x153   : > { %v519_v12 = vxor.u32 2147483648, %v518_v2  ;;  %v764_v26 = vshll.u32 %v2667_v5, %v761_v55  ;;  %v767_v52 = vshll.u32 %v2668_v9, %v761_v55  ;;  %v1353_v48 = vsub.s32 4, %v3159_v34 }
 0x154   : > { %v1333_v32 = vsub.s32 0, %v3167_v3  ;;  %v765_v44 = vshrl.u32 %v2668_v9, %v762_v4  ;;  %v768_v41 = vshrl.u32 %v2669_v11, %v762_v4  ;;  %v771_v28 = vshrl.u32 %v2670_v13, %v762_v4 }
 0x155   : > { %v520_v18 = vsel %vm437_vm0, %v519_v12, %v518_v2  ;;  %v770_v57 = vshll.u32 %v2669_v11, %v761_v55  ;;  %v1582_v46 = vand.u32 2139095040, %v3173_v16  ;;  %v773_v8 = vshll.u32 %v2670_v13, %v761_v55 }
 0x156   : > { %v523_v0 = vsel %vm3151_vm7, %v2830_v35, %v520_v18  ;;  %v2266_v47 = vmin.u32 %v1333_v32, %v3167_v3  ;;  %v766_v49 = vor.u32 %v765_v44, %v764_v26  ;;  %v769_v24 = vor.u32 %v768_v41, %v767_v52 }
 0x157   : > { %2529 = vcosq.f32 %v523_v0  ;;  %v772_v17 = vor.u32 %v771_v28, %v770_v57  ;;  %v774_v25 = vshrl.u32 %v2671_v15, %v762_v4  ;;  %vm779_vm11 = vcmp.lt.s32.totalorder %v3176_v14, 1 }
 0x158   : > { %2531 = vsinq.f32 %v523_v0  ;;  %v1335_v7 = vclz %v2266_v47  ;;  %v776_v59 = vshll.u32 %v2671_v15, %v761_v55  ;;  %v777_v50 = vshrl.u32 %v2672_v22, %v762_v4 }
 0x159   : > { %vm780_vm12 = vcmp.lt.s32.totalorder %v3176_v14, 2  ;;  %vm534_vm13 = vcmp.eq.s32.totalorder %v3165_v6, 2  ;;  %v763_v38 = vshrl.u32 %v2667_v5, %v762_v4  ;;  %v775_v61 = vor.u32 %v774_v25, %v773_v8 }
 0x15a   : > { %v2267_v36 = vadd.s32 4294967294, %v1335_v7  ;;  %vm781_vm14 = vcmp.lt.s32.totalorder %v3176_v14, 3  ;;  %vm782_vm15 = vcmp.lt.s32.totalorder %v3176_v14, 4  ;;  %vm531_vm0 = vcmp.eq.s32.totalorder %v3165_v6, 0 }
 0x15b   : > { %vm1269_vm1 = vcmp.lt.s32.totalorder %v2848_v53, 0  ;;  %v778_v27 = vor.u32 %v777_v50, %v776_v59  ;;  %v784_v30 = vsel %vm782_vm15, %v772_v17, 2102212464  ;;  %v787_v19 = vsel %vm779_vm11, %v766_v49, %v769_v24 }
 0x15c   : > { %vm2268_vm2 = vcmp.lt.s32.totalorder %v2267_v36, 0  ;;  %vm530_vm3 = vcmp.lt.s32.totalorder %v3165_v6, 2  ;;  %v783_v33 = vsel %vm779_vm11, %v763_v38, %v766_v49  ;;  %v788_v54 = vsel %vm782_vm15, %v775_v61, 920167782 }
 0x15d   : > { %v1338_v60 = vsel %vm2268_vm2, 0, %v2267_v36  ;;  %v1583_v1 = vshrl.u32 %v1582_v46, 23  ;;  %vm527_vm4 = vweird.f32 %v2830_v35  ;;  %v789_v45 = vsel %vm781_vm14, %v772_v17, %v788_v54 }
 0x15e   : > { %v1339_v42 = vsub.s32 32, %v1338_v60  ;;  %v1343_v43 = vsub.s32 4294967266, %v1338_v60  ;;  %v791_v23 = vsel %vm779_vm11, %v769_v24, %v772_v17  ;;  %vm3228_vm5 = vcmp.le.f32.partialorder %v1267_v51, 0.7853982 }
 0x15f   : > { %v785_v63 = vsel %vm781_vm14, %v769_v24, %v784_v30  ;;  %v790_v2 = vsel %vm780_vm12, %v787_v19, %v789_v45  ;;  %v792_v55 = vsel %vm782_vm15, %v778_v27, 1326507024  ;;  %v2277_v12 = vadd.s32 4294967169, %v1583_v1 }
 0x160   : > { %v1340_v4 = vshll.u32 %v3167_v3, %v1338_v60  ;;  %v1341_v32 = vshrl.u32 %v1323_v40, %v1339_v42  ;;  %v1344_v18 = vadd.s32 127, %v1343_v43  ;;  %v793_v51 = vsel %vm781_vm14, %v775_v61, %v792_v55 }
 0x161   : > { %v2530_v26 = vpop.eup %2529  ;;  %v794_v44 = vsel %vm780_vm12, %v791_v23, %v793_v51  ;;  %v3244_v41 = vmul.u32.u64.low %v3178_v20, %v790_v2  ;;  %v3245_v0 = vmul.u32.u64.high %v3178_v20, %v790_v2, %v3244_v41  ;;  %v1589_v47 = vadd.s32 1, %v2277_v12 }
 0x162   : > { %v2532_v52 = vpop.eup %2531  ;;  %v535_v28 = vxor.u32 2147483648, %v2530_v26  ;;  %v1342_v57 = vor.u32 %v1341_v32, %v1340_v4  ;;  %v1345_v46 = vshll.u32 %v1344_v18, 23  ;;  %v1579_v3 = vand.u32 2147483647, %v3173_v16 }
 0x163   : > { %v532_v40 = vxor.u32 2147483648, %v2532_v52  ;;  %v3250_v7 = vmul.u32.u64.low %v3178_v20, %v794_v44  ;;  %v3251_v49 = vmul.u32.u64.high %v3178_v20, %v794_v44, %v3250_v7  ;;  %vm1590_vm6 = vcmp.gt.s32.totalorder %v1589_v47, 0 }
 0x164   : > { %v536_v24 = vsel %vm534_vm13, %v535_v28, %v2532_v52  ;;  %v1346_v17 = vor.u32 4788187, %v1345_v46  ;;  %v786_v8 = vsel %vm780_vm12, %v783_v33, %v785_v63  ;;  %v1591_v25 = vsel %vm1590_vm6, %v1589_v47, 0 }
 0x165   : > { %v533_v36 = vsel %vm531_vm0, %v2530_v26, %v532_v40  ;;  %v1354_v59 = vsel %vm1269_vm1, %v1353_v48, %v3159_v34  ;;  %v805_v50 = vadd.s32 1, %v3245_v0  ;;  %v1593_v38 = vand.u32 31, %v1591_v25 }
 0x166   : > { %v537_v61 = vsel %vm530_vm3, %v533_v36, %v536_v24  ;;  %v1347_v27 = vand.u32 2147483647, %v1346_v17  ;;  %v1349_v30 = vcvt.s32.f32 %v1342_v57  ;;  %v1586_v14 = vand.u32 8388607, %v1579_v3 }
 0x167   : > { %v538_v19 = vsel %vm527_vm4, nan, %v537_v61  ;;  %v802_v60 = vmul.u32 %v3178_v20, %v786_v8  ;;  %vm804_vm7 = vc.u32 %v3251_v49, %v3244_v41  ;;  %v1594_v34 = vsub.s32 32, %v1593_v38 }
 0x168   : > { %2099 = vst [vmem:[%s3138_s9] sm:$0xff] %v538_v19  ;;  %v1350_v48 = vmul.f32 %v1349_v30, %v1347_v27  ;;  %v1356_v6 = vsel %vm3228_vm5, 0, %v1354_v59  ;;  %v806_v33 = vsel %vm804_vm7, %v805_v50, %v3245_v0  ;;  %v1592_v54 = vshrl.u32 %v1591_v25, 5 }
 0x169   : > { %v807_v1 = vadd.s32 %v806_v33, %v802_v60  ;;  %v1596_v42 = vshll.u32 %v2667_v5, %v1593_v38  ;;  %v1597_v35 = vshrl.u32 %v2668_v9, %v1594_v34  ;;  %v1600_v43 = vshrl.u32 %v2669_v11, %v1594_v34 }
 0x16a   : > { %v1351_v20 = vxor.u32 2147483648, %v1350_v48  ;;  %v1599_v45 = vshll.u32 %v2668_v9, %v1593_v38  ;;  %v1602_v23 = vshll.u32 %v2669_v11, %v1593_v38  ;;  %v1603_v63 = vshrl.u32 %v2670_v13, %v1594_v34 }
 0x16b   : > { %v808_v2 = vadd.s32 536870912, %v807_v1  ;;  %v1598_v55 = vor.u32 %v1597_v35, %v1596_v42  ;;  %v1605_v12 = vshll.u32 %v2670_v13, %v1593_v38  ;;  %v1606_v4 = vshrl.u32 %v2671_v15, %v1594_v34 }
 0x16c   : > { %v1352_v32 = vsel %vm1269_vm1, %v1351_v20, %v1350_v48  ;;  %v1601_v18 = vor.u32 %v1600_v43, %v1599_v45  ;;  %v1604_v51 = vor.u32 %v1603_v63, %v1602_v23  ;;  %v1609_v26 = vshrl.u32 %v2672_v22, %v1594_v34 }
 0x16d   : > { %v1355_v44 = vsel %vm3228_vm5, %v2848_v53, %v1352_v32  ;;  %v809_v0 = vshrl.u32 %v808_v2, 30  ;;  %v1607_v47 = vor.u32 %v1606_v4, %v1605_v12  ;;  %v1608_v52 = vshll.u32 %v2671_v15, %v1593_v38 }
 0x16e   : > { %2533 = vcosq.f32 %v1355_v44  ;;  %v1360_v28 = vadd.s32 3, %v1356_v6  ;;  %v1587_v57 = vor.u32 8388608, %v1586_v14  ;;  %vm1611_vm8 = vcmp.lt.s32.totalorder %v1592_v54, 1 }
 0x16f   : > { %2535 = vsinq.f32 %v1355_v44  ;;  %v810_v46 = vshll.u32 %v809_v0, 30  ;;  %v1610_v40 = vor.u32 %v1609_v26, %v1608_v52  ;;  %vm1614_vm9 = vcmp.lt.s32.totalorder %v1592_v54, 4 }
 0x170   : > { %v1595_v7 = vshrl.u32 %v2667_v5, %v1594_v34  ;;  %vm1613_vm10 = vcmp.lt.s32.totalorder %v1592_v54, 3  ;;  %v1619_v24 = vsel %vm1611_vm8, %v1598_v55, %v1601_v18  ;;  %v1620_v37 = vsel %vm1614_vm9, %v1607_v47, 920167782 }
 0x171   : > { %v3296_v17 = vsub.s32 %v807_v1, %v810_v46  ;;  %vm1612_vm11 = vcmp.lt.s32.totalorder %v1592_v54, 2  ;;  %v1616_v8 = vsel %vm1614_vm9, %v1604_v51, 2102212464  ;;  %v1621_v25 = vsel %vm1613_vm10, %v1604_v51, %v1620_v37 }
 0x172   : > { %v833_v36 = vsub.s32 4, %v809_v0  ;;  %v1622_v59 = vsel %vm1612_vm11, %v1619_v24, %v1621_v25  ;;  %v1623_v50 = vsel %vm1611_vm8, %v1601_v18, %v1604_v51  ;;  %v1627_v38 = vshll.u32 %v1587_v57, 8 }
 0x173   : > { %v1361_v61 = vand.u32 3, %v1360_v28  ;;  %v813_v27 = vsub.s32 0, %v3296_v17  ;;  %v1615_v30 = vsel %vm1611_vm8, %v1595_v7, %v1598_v55  ;;  %v1624_v14 = vsel %vm1614_vm9, %v1610_v40, 1326507024 }
 0x174   : > { %v1617_v19 = vsel %vm1613_vm10, %v1601_v18, %v1616_v8  ;;  %v1625_v60 = vsel %vm1613_vm10, %v1607_v47, %v1624_v14  ;;  %v3307_v34 = vmul.u32.u64.low %v1627_v38, %v1622_v59  ;;  %v3308_v48 = vmul.u32.u64.high %v1627_v38, %v1622_v59, %v3307_v34  ;;  %v3341_v59 = vpop.f32.mrb[6].mxu0 }
 0x175   : > { %vm1359_vm12 = vweird.f32 %v2848_v53  ;;  %vm749_vm13 = vcmp.lt.s32.totalorder %v3116_v29, 0  ;;  %v2246_v6 = vmin.u32 %v813_v27, %v3296_v17  ;;  %v1626_v33 = vsel %vm1612_vm11, %v1623_v50, %v1625_v60 }
 0x176   : > { %v834_v1 = vsel %vm749_vm13, %v833_v36, %v809_v0  ;;  %v3316_v42 = vmul.u32.u64.low %v1627_v38, %v1626_v33  ;;  %v3317_v35 = vmul.u32.u64.high %v1627_v38, %v1626_v33, %v3316_v42  ;;  %v646_v43 = vand.u32 2139095040, %v3182_v21 }
 0x177   : > { %vm3322_vm14 = vcmp.le.f32.partialorder %v747_v31, 0.7853982  ;;  %v815_v45 = vclz %v2246_v6  ;;  %v1618_v23 = vsel %vm1612_vm11, %v1615_v30, %v1617_v19  ;;  %v643_v63 = vand.u32 2147483647, %v3182_v21 }
 0x178   : > { %v2534_v2 = vpop.eup %2533  ;;  %vm1362_vm15 = vcmp.lt.s32.totalorder %v1361_v61, 2  ;;  %vm1363_vm0 = vcmp.eq.s32.totalorder %v1361_v61, 0  ;;  %v1637_v55 = vadd.s32 1, %v3308_v48  ;;  %v647_v12 = vshrl.u32 %v646_v43, 23 }
 0x179   : > { %v2536_v4 = vpop.eup %2535  ;;  %vm1366_vm1 = vcmp.eq.s32.totalorder %v1361_v61, 2  ;;  %v1367_v32 = vxor.u32 2147483648, %v2534_v2  ;;  %v2247_v18 = vadd.s32 4294967294, %v815_v45  ;;  %v836_v31 = vsel %vm3322_vm14, 0, %v834_v1 }
 0x17a   : > { %v1364_v51 = vxor.u32 2147483648, %v2536_v4  ;;  %v1634_v26 = vmul.u32 %v1627_v38, %v1618_v23  ;;  %vm1636_vm2 = vc.u32 %v3317_v35, %v3307_v34  ;;  %v2241_v54 = vadd.s32 4294967169, %v647_v12 }
 0x17b   : > { %v1368_v44 = vsel %vm1366_vm1, %v1367_v32, %v2536_v4  ;;  %vm2248_vm3 = vcmp.lt.s32.totalorder %v2247_v18, 0  ;;  %v1638_v0 = vsel %vm1636_vm2, %v1637_v55, %v3308_v48  ;;  %v650_v47 = vand.u32 8388607, %v643_v63 }
 0x17c   : > { %v1365_v52 = vsel %vm1363_vm0, %v2534_v2, %v1364_v51  ;;  %v818_v28 = vsel %vm2248_vm3, 0, %v2247_v18  ;;  %v1639_v57 = vadd.s32 %v1638_v0, %v1634_v26  ;;  %v653_v46 = vadd.s32 1, %v2241_v54 }
 0x17d   : > { %v1369_v40 = vsel %vm1362_vm15, %v1365_v52, %v1368_v44  ;;  %v803_v7 = vadd.s32 %v3244_v41, %v3251_v49  ;;  %v819_v24 = vsub.s32 32, %v818_v28  ;;  %v823_v37 = vsub.s32 4294967266, %v818_v28 }
 0x17e   : > { %v1370_v8 = vsel %vm1359_vm12, nan, %v1369_v40  ;;  %v840_v25 = vadd.s32 3, %v836_v31  ;;  %v1640_v36 = vadd.s32 536870912, %v1639_v57  ;;  %vm654_vm4 = vcmp.gt.s32.totalorder %v653_v46, 0 }
 0x17f   : > { %2107 = vst [vmem:[%s3138_s9 + $0x40] sm:$0xff] %v1370_v8  ;;  %v820_v50 = vshll.u32 %v3296_v17, %v818_v28  ;;  %v821_v38 = vshrl.u32 %v803_v7, %v819_v24  ;;  %v824_v27 = vadd.s32 127, %v823_v37  ;;  %v655_v61 = vsel %vm654_vm4, %v653_v46, 0  ;;  %v3352_v17 = vld [vmem:[%s4210_s2] ss:$0 sm:$0xff] }
 0x180   : > { %v1641_v30 = vshrl.u32 %v1640_v36, 30  ;;  %v651_v14 = vor.u32 8388608, %v650_v47  ;;  %v657_v19 = vand.u32 31, %v655_v61  ;;  %v3345_v60 = vand.u32 3, %v840_v25 }
 0x181   : > { %v822_v41 = vor.u32 %v821_v38, %v820_v50  ;;  %v825_v49 = vshll.u32 %v824_v27, 23  ;;  %vm1581_vm5 = vcmp.lt.s32.totalorder %v3173_v16, 0  ;;  %v1635_v33 = vadd.s32 %v3307_v34, %v3317_v35 }
 0x182   : > { %v1642_v53 = vshll.u32 %v1641_v30, 30  ;;  %v658_v48 = vsub.s32 32, %v657_v19  ;;  %v3356_v1 = vadd.f32 %v3352_v17, %v2851_v58  ;;  %v3360_v42 = vadd.f32 %v3352_v17, %v2934_v10 }
 0x183   : > { %v826_v6 = vor.u32 4788187, %v825_v49  ;;  %v656_v45 = vshrl.u32 %v655_v61, 5  ;;  %v3365_v2 = vshll.u32 %v651_v14, 8  ;;  %v829_v35 = vcvt.s32.f32 %v822_v41 }
 0x184   : > { %v3362_v43 = vsub.s32 %v1639_v57, %v1642_v53  ;;  %v661_v23 = vshrl.u32 %v2668_v9, %v658_v48  ;;  %v664_v55 = vshrl.u32 %v2669_v11, %v658_v48  ;;  %v667_v12 = vshrl.u32 %v2670_v13, %v658_v48 }
 0x185   : > { %v827_v34 = vand.u32 2147483647, %v826_v6  ;;  %v1665_v4 = vsub.s32 4, %v1641_v30  ;;  %v660_v32 = vshll.u32 %v2667_v5, %v657_v19  ;;  %v663_v10 = vshll.u32 %v2668_v9, %v657_v19 }
 0x186   : > { %v1645_v58 = vsub.s32 0, %v3362_v43  ;;  %v666_v31 = vshll.u32 %v2669_v11, %v657_v19  ;;  %v669_v51 = vshll.u32 %v2670_v13, %v657_v19  ;;  %v670_v26 = vshrl.u32 %v2671_v15, %v658_v48 }
 0x187   : > { %v830_v18 = vmul.f32 %v829_v35, %v827_v34  ;;  %v662_v44 = vor.u32 %v661_v23, %v660_v32  ;;  %v665_v0 = vor.u32 %v664_v55, %v663_v10  ;;  %v673_v47 = vshrl.u32 %v2672_v22, %v658_v48 }
 0x188   : > { %v2278_v54 = vmin.u32 %v1645_v58, %v3362_v43  ;;  %v668_v28 = vor.u32 %v667_v12, %v666_v31  ;;  %v671_v57 = vor.u32 %v670_v26, %v669_v51  ;;  %v672_v46 = vshll.u32 %v2671_v15, %v657_v19  ;;  %v3390_v19 = vpop.f32.mrb[6].mxu1 }
 0x189   : > { %v831_v52 = vxor.u32 2147483648, %v830_v18  ;;  %v1666_v7 = vsel %vm1581_vm5, %v1665_v4, %v1641_v30  ;;  %v659_v24 = vshrl.u32 %v2667_v5, %v658_v48  ;;  %v1478_v37 = vand.u32 2139095040, %v3356_v1 }
 0x18a   : > { %v1647_v40 = vclz %v2278_v54  ;;  %v674_v25 = vor.u32 %v673_v47, %v672_v46  ;;  %vm675_vm6 = vcmp.lt.s32.totalorder %v656_v45, 1  ;;  %vm676_vm7 = vcmp.lt.s32.totalorder %v656_v45, 2 }
 0x18b   : > { %v832_v8 = vsel %vm749_vm13, %v831_v52, %v830_v18  ;;  %vm677_vm8 = vcmp.lt.s32.totalorder %v656_v45, 3  ;;  %vm678_vm9 = vcmp.lt.s32.totalorder %v656_v45, 4  ;;  %v683_v27 = vsel %vm675_vm6, %v662_v44, %v665_v0 }
 0x18c   : > { %v835_v36 = vsel %vm3322_vm14, %v3116_v29, %v832_v8  ;;  %v2279_v50 = vadd.s32 4294967294, %v1647_v40  ;;  %v680_v38 = vsel %vm678_vm9, %v668_v28, 2102212464  ;;  %v684_v61 = vsel %vm678_vm9, %v671_v57, 920167782 }
 0x18d   : > { %2537 = vcosq.f32 %v835_v36  ;;  %v679_v30 = vsel %vm675_vm6, %v659_v24, %v662_v44  ;;  %v685_v14 = vsel %vm677_vm8, %v668_v28, %v684_v61  ;;  %v687_v49 = vsel %vm675_vm6, %v665_v0, %v668_v28 }
 0x18e   : > { %2539 = vsinq.f32 %v835_v36  ;;  %vm2280_vm10 = vcmp.lt.s32.totalorder %v2279_v50, 0  ;;  %v686_v20 = vsel %vm676_vm7, %v683_v27, %v685_v14  ;;  %v688_v53 = vsel %vm678_vm9, %v674_v25, 1326507024 }
 0x18f   : > { %v1650_v41 = vsel %vm2280_vm10, 0, %v2279_v50  ;;  %v681_v23 = vsel %vm677_vm8, %v665_v0, %v680_v38  ;;  %v689_v34 = vsel %vm677_vm8, %v671_v57, %v688_v53  ;;  %vm3409_vm11 = vcmp.le.f32.partialorder %v1579_v3, 0.7853982 }
 0x190   : > { %v1651_v48 = vsub.s32 32, %v1650_v41  ;;  %v1655_v6 = vsub.s32 4294967266, %v1650_v41  ;;  %v1652_v35 = vshll.u32 %v3362_v43, %v1650_v41  ;;  %v690_v55 = vsel %vm676_vm7, %v687_v49, %v689_v34 }
 0x191   : > { %v3399_v12 = vmul.u32.u64.low %v3365_v2, %v686_v20  ;;  %v3400_v58 = vmul.u32.u64.high %v3365_v2, %v686_v20, %v3399_v12  ;;  %v3404_v10 = vmul.u32.u64.low %v3365_v2, %v690_v55  ;;  %v3405_v18 = vmul.u32.u64.high %v3365_v2, %v690_v55, %v3404_v10 }
 0x192   : > { %v1653_v4 = vshrl.u32 %v1635_v33, %v1651_v48  ;;  %v1656_v32 = vadd.s32 127, %v1655_v6  ;;  %v682_v43 = vsel %vm676_vm7, %v679_v30, %v681_v23  ;;  %v1479_v51 = vshrl.u32 %v1478_v37, 23 }
 0x193   : > { %v1668_v44 = vsel %vm3409_vm11, 0, %v1666_v7  ;;  %v701_v33 = vadd.s32 1, %v3400_v58  ;;  %v1475_v0 = vand.u32 2147483647, %v3356_v1  ;;  %v958_v52 = vand.u32 2139095040, %v3360_v42 }
 0x194   : > { %v1654_v26 = vor.u32 %v1653_v4, %v1652_v35  ;;  %v1657_v54 = vshll.u32 %v1656_v32, 23  ;;  %v2273_v47 = vadd.s32 4294967169, %v1479_v51  ;;  %vm843_vm12 = vcmp.eq.s32.totalorder %v3345_v60, 0 }
 0x195   : > { %v698_v28 = vmul.u32 %v3365_v2, %v682_v43  ;;  %vm700_vm13 = vc.u32 %v3405_v18, %v3399_v12  ;;  %vm846_vm14 = vcmp.eq.s32.totalorder %v3345_v60, 2  ;;  %v1672_v57 = vadd.s32 3, %v1668_v44 }
 0x196   : > { %v1658_v3 = vor.u32 4788187, %v1657_v54  ;;  %v702_v46 = vsel %vm700_vm13, %v701_v33, %v3400_v58  ;;  %v1485_v40 = vadd.s32 1, %v2273_v47  ;;  %v1661_v8 = vcvt.s32.f32 %v1654_v26 }
 0x197   : > { %v2538_v45 = vpop.eup %2537  ;;  %v703_v25 = vadd.s32 %v702_v46, %v698_v28  ;;  %v1482_v50 = vand.u32 8388607, %v1475_v0  ;;  %v959_v2 = vshrl.u32 %v958_v52, 23  ;;  %vm839_vm0 = vweird.f32 %v3116_v29 }
 0x198   : > { %v2540_v7 = vpop.eup %2539  ;;  %v847_v24 = vxor.u32 2147483648, %v2538_v45  ;;  %v1659_v37 = vand.u32 2147483647, %v1658_v3  ;;  %vm1486_vm15 = vcmp.gt.s32.totalorder %v1485_v40, 0  ;;  %vm842_vm1 = vcmp.lt.s32.totalorder %v3345_v60, 2 }
 0x199   : > { %v844_v36 = vxor.u32 2147483648, %v2540_v7  ;;  %v704_v61 = vadd.s32 536870912, %v703_v25  ;;  %v1487_v30 = vsel %vm1486_vm15, %v1485_v40, 0  ;;  %v3431_v53 = vand.u32 3, %v1672_v57 }
 0x19a   : > { %v848_v38 = vsel %vm846_vm14, %v847_v24, %v2540_v7  ;;  %v1662_v27 = vmul.f32 %v1661_v8, %v1659_v37  ;;  %v1489_v41 = vand.u32 31, %v1487_v30  ;;  %v1483_v23 = vor.u32 8388608, %v1482_v50 }
 0x19b   : > { %v845_v14 = vsel %vm843_vm12, %v2538_v45, %v844_v36  ;;  %v3433_v48 = vshrl.u32 %v704_v61, 30  ;;  %v955_v35 = vand.u32 2147483647, %v3360_v42  ;;  %v2253_v58 = vadd.s32 4294967169, %v959_v2 }
 0x19c   : > { %v849_v20 = vsel %vm842_vm1, %v845_v14, %v848_v38  ;;  %v1663_v49 = vxor.u32 2147483648, %v1662_v27  ;;  %v1490_v34 = vsub.s32 32, %v1489_v41  ;;  %v1492_v60 = vshll.u32 %v2667_v5, %v1489_v41 }
 0x19d   : > { %v850_v6 = vsel %vm839_vm0, nan, %v849_v20  ;;  %v706_v55 = vshll.u32 %v3433_v48, 30  ;;  %v1495_v10 = vshll.u32 %v2668_v9, %v1489_v41  ;;  %v1498_v26 = vshll.u32 %v2669_v11, %v1489_v41 }
 0x19e   : > { %2102 = vst [vmem:[%s3138_s9 + $0x18] sm:$0xff] %v850_v6  ;;  %v1664_v29 = vsel %vm1581_vm5, %v1663_v49, %v1662_v27  ;;  %v1493_v32 = vshrl.u32 %v2668_v9, %v1490_v34  ;;  %v1496_v43 = vshrl.u32 %v2669_v11, %v1490_v34  ;;  %v1499_v54 = vshrl.u32 %v2670_v13, %v1490_v34 }
 0x19f   : > { %v1667_v4 = vsel %vm3409_vm11, %v3173_v16, %v1664_v29  ;;  %v3447_v51 = vsub.s32 %v703_v25, %v706_v55  ;;  %v699_v44 = vadd.s32 %v3399_v12, %v3405_v18  ;;  %v1488_v33 = vshrl.u32 %v1487_v30, 5 }
 0x1a0   : > { %2541 = vcosq.f32 %v1667_v4  ;;  %v3453_v31 = vshll.u32 %v1483_v23, 8  ;;  %v1494_v52 = vor.u32 %v1493_v32, %v1492_v60  ;;  %v1497_v3 = vor.u32 %v1496_v43, %v1495_v10  ;;  %v3483_v43 = vpop.f32.mrb[7].mxu0 }
 0x1a1   : > { %2543 = vsinq.f32 %v1667_v4  ;;  %v709_v47 = vsub.s32 0, %v3447_v51  ;;  %v1500_v28 = vor.u32 %v1499_v54, %v1498_v26  ;;  %v1501_v45 = vshll.u32 %v2670_v13, %v1489_v41 }
 0x1a2   : > { %v1502_v57 = vshrl.u32 %v2671_v15, %v1490_v34  ;;  %v1504_v46 = vshll.u32 %v2671_v15, %v1489_v41  ;;  %v1505_v40 = vshrl.u32 %v2672_v22, %v1490_v34  ;;  %vm1678_vm2 = vcmp.eq.s32.totalorder %v3431_v53, 2 }
 0x1a3   : > { %v2242_v12 = vmin.u32 %v709_v47, %v3447_v51  ;;  %v729_v18 = vsub.s32 4, %v3433_v48  ;;  %v3465_v7 = vand.u32 8388607, %v955_v35  ;;  %v965_v24 = vadd.s32 1, %v2253_v58 }
 0x1a4   : > { %vm1675_vm3 = vcmp.eq.s32.totalorder %v3431_v53, 0  ;;  %v1491_v37 = vshrl.u32 %v2667_v5, %v1490_v34  ;;  %v1503_v8 = vor.u32 %v1502_v57, %v1501_v45  ;;  %v1506_v25 = vor.u32 %v1505_v40, %v1504_v46 }
 0x1a5   : > { %vm1507_vm4 = vcmp.lt.s32.totalorder %v1488_v33, 1  ;;  %vm1674_vm5 = vcmp.lt.s32.totalorder %v3431_v53, 2  ;;  %vm645_vm6 = vcmp.lt.s32.totalorder %v3182_v21, 0  ;;  %v711_v36 = vclz %v2242_v12 }
 0x1a6   : > { %vm1508_vm7 = vcmp.lt.s32.totalorder %v1488_v33, 2  ;;  %vm1509_vm8 = vcmp.lt.s32.totalorder %v1488_v33, 3  ;;  %vm1510_vm9 = vcmp.lt.s32.totalorder %v1488_v33, 4  ;;  %vm1671_vm10 = vweird.f32 %v3173_v16 }
 0x1a7   : > { %v1512_v50 = vsel %vm1510_vm9, %v1500_v28, 2102212464  ;;  %v1515_v2 = vsel %vm1507_vm4, %v1494_v52, %v1497_v3  ;;  %v1516_v38 = vsel %vm1510_vm9, %v1503_v8, 920167782  ;;  %v1519_v27 = vsel %vm1507_vm4, %v1497_v3, %v1500_v28 }
 0x1a8   : > { %v2243_v61 = vadd.s32 4294967294, %v711_v36  ;;  %v1511_v30 = vsel %vm1507_vm4, %v1491_v37, %v1494_v52  ;;  %v1517_v14 = vsel %vm1509_vm8, %v1500_v28, %v1516_v38  ;;  %v1520_v41 = vsel %vm1510_vm9, %v1506_v25, 1326507024 }
 0x1a9   : > { %v1513_v20 = vsel %vm1509_vm8, %v1497_v3, %v1512_v50  ;;  %v1518_v49 = vsel %vm1508_vm7, %v1515_v2, %v1517_v14  ;;  %v1521_v6 = vsel %vm1509_vm8, %v1503_v8, %v1520_v41  ;;  %vm966_vm11 = vcmp.gt.s32.totalorder %v965_v24, 0 }
 0x1aa   : > { %v2542_v23 = vpop.eup %2541  ;;  %vm2244_vm12 = vcmp.lt.s32.totalorder %v2243_v61, 0  ;;  %v1522_v34 = vsel %vm1508_vm7, %v1519_v27, %v1521_v6  ;;  %v3475_v29 = vmul.u32.u64.low %v3453_v31, %v1518_v49  ;;  %v3476_v55 = vmul.u32.u64.high %v3453_v31, %v1518_v49, %v3475_v29 }
 0x1ab   : > { %v2544_v60 = vpop.eup %2543  ;;  %v1679_v58 = vxor.u32 2147483648, %v2542_v23  ;;  %v714_v4 = vsel %vm2244_vm12, 0, %v2243_v61  ;;  %v3480_v32 = vmul.u32.u64.low %v3453_v31, %v1522_v34  ;;  %v3481_v10 = vmul.u32.u64.high %v3453_v31, %v1522_v34, %v3480_v32 }
 0x1ac   : > { %v1676_v26 = vxor.u32 2147483648, %v2544_v60  ;;  %v715_v54 = vsub.s32 32, %v714_v4  ;;  %v719_v47 = vsub.s32 4294967266, %v714_v4  ;;  %v1514_v52 = vsel %vm1508_vm7, %v1511_v30, %v1513_v20 }
 0x1ad   : > { %v1680_v3 = vsel %vm1678_vm2, %v1679_v58, %v2544_v60  ;;  %v716_v28 = vshll.u32 %v3447_v51, %v714_v4  ;;  %v963_v45 = vor.u32 8388608, %v3465_v7  ;;  %v967_v57 = vsel %vm966_vm11, %v965_v24, 0 }
 0x1ae   : > { %v1677_v46 = vsel %vm1675_vm3, %v2542_v23, %v1676_v26  ;;  %v717_v40 = vshrl.u32 %v699_v44, %v715_v54  ;;  %v720_v12 = vadd.s32 127, %v719_v47  ;;  %v1533_v37 = vadd.s32 1, %v3476_v55 }
 0x1af   : > { %v1681_v33 = vsel %vm1674_vm5, %v1677_v46, %v1680_v3  ;;  %v730_v8 = vsel %vm645_vm6, %v729_v18, %v3433_v48  ;;  %v1530_v51 = vmul.u32 %v3453_v31, %v1514_v52  ;;  %vm1532_vm13 = vc.u32 %v3481_v10, %v3475_v29 }
 0x1b0   : > { %v1682_v7 = vsel %vm1671_vm10, nan, %v1681_v33  ;;  %v718_v24 = vor.u32 %v717_v40, %v716_v28  ;;  %v721_v44 = vshll.u32 %v720_v12, 23  ;;  %v1534_v25 = vsel %vm1532_vm13, %v1533_v37, %v3476_v55 }
 0x1b1   : > { %2110 = vst [vmem:[%s3138_s9 + $0x58] sm:$0xff] %v1682_v7  ;;  %vm3508_vm14 = vcmp.le.f32.partialorder %v643_v63, 0.7853982  ;;  %v1535_v48 = vadd.s32 %v1534_v25, %v1530_v51  ;;  %v969_v18 = vand.u32 31, %v967_v57  ;;  %v3514_v50 = vshll.u32 %v963_v45, 8 }
 0x1b2   : > { %v722_v31 = vor.u32 4788187, %v721_v44  ;;  %v732_v36 = vsel %vm3508_vm14, 0, %v730_v8  ;;  %v725_v16 = vcvt.s32.f32 %v718_v24  ;;  %v3516_v38 = vshrl.u32 %v967_v57, 5 }
 0x1b3   : > { %v1536_v2 = vadd.s32 536870912, %v1535_v48  ;;  %v970_v27 = vsub.s32 32, %v969_v18  ;;  %v972_v30 = vshll.u32 %v2667_v5, %v969_v18  ;;  %v975_v63 = vshll.u32 %v2668_v9, %v969_v18 }
 0x1b4   : > { %v723_v61 = vand.u32 2147483647, %v722_v31  ;;  %v978_v14 = vshll.u32 %v2669_v11, %v969_v18  ;;  %v981_v6 = vshll.u32 %v2670_v13, %v969_v18  ;;  %v736_v58 = vadd.s32 3, %v732_v36 }
 0x1b5   : > { %v1537_v41 = vshrl.u32 %v1536_v2, 30  ;;  %v973_v20 = vshrl.u32 %v2668_v9, %v970_v27  ;;  %v976_v49 = vshrl.u32 %v2669_v11, %v970_v27  ;;  %v979_v34 = vshrl.u32 %v2670_v13, %v970_v27 }
 0x1b6   : > { %v726_v23 = vmul.f32 %v725_v16, %v723_v61  ;;  %v982_v55 = vshrl.u32 %v2671_v15, %v970_v27  ;;  %v985_v60 = vshrl.u32 %v2672_v22, %v970_v27  ;;  %v984_v3 = vshll.u32 %v2671_v15, %v969_v18  ;;  %v3565_v16 = vpop.f32.mrb[7].mxu1 }
 0x1b7   : > { %v1538_v4 = vshll.u32 %v1537_v41, 30  ;;  %v974_v32 = vor.u32 %v973_v20, %v972_v30  ;;  %v977_v26 = vor.u32 %v976_v49, %v975_v63  ;;  %v980_v47 = vor.u32 %v979_v34, %v978_v14 }
 0x1b8   : > { %v727_v54 = vxor.u32 2147483648, %v726_v23  ;;  %v983_v52 = vor.u32 %v982_v55, %v981_v6  ;;  %vm987_vm15 = vcmp.lt.s32.totalorder %v3516_v38, 1  ;;  %vm990_vm0 = vcmp.lt.s32.totalorder %v3516_v38, 4 }
 0x1b9   : > { %v3528_v28 = vsub.s32 %v1535_v48, %v1538_v4  ;;  %v3534_v45 = vadd.f32 %v3352_v17, %v3014_v39  ;;  %v986_v46 = vor.u32 %v985_v60, %v984_v3  ;;  %v995_v40 = vsel %vm987_vm15, %v974_v32, %v977_v26 }
 0x1ba   : > { %v728_v57 = vsel %vm645_vm6, %v727_v54, %v726_v23  ;;  %v996_v12 = vsel %vm990_vm0, %v983_v52, 920167782  ;;  %vm988_vm1 = vcmp.lt.s32.totalorder %v3516_v38, 2  ;;  %vm989_vm2 = vcmp.lt.s32.totalorder %v3516_v38, 3 }
 0x1bb   : > { %v731_v37 = vsel %vm3508_vm14, %v3182_v21, %v728_v57  ;;  %v1541_v33 = vsub.s32 0, %v3528_v28  ;;  %v1561_v39 = vsub.s32 4, %v1537_v41  ;;  %v971_v8 = vshrl.u32 %v2667_v5, %v970_v27 }
 0x1bc   : > { %2545 = vcosq.f32 %v731_v37  ;;  %v997_v51 = vsel %vm989_vm2, %v980_v47, %v996_v12  ;;  %v992_v24 = vsel %vm990_vm0, %v980_v47, 2102212464  ;;  %v999_v25 = vsel %vm987_vm15, %v977_v26, %v980_v47 }
 0x1bd   : > { %2547 = vsinq.f32 %v731_v37  ;;  %v2274_v7 = vmin.u32 %v1541_v33, %v3528_v28  ;;  %v998_v44 = vsel %vm988_vm1, %v995_v40, %v997_v51  ;;  %v1000_v53 = vsel %vm990_vm0, %v986_v46, 1326507024 }
 0x1be   : > { %v3561_v48 = vmul.u32.u64.low %v3514_v50, %v998_v44  ;;  %v3562_v18 = vmul.u32.u64.high %v3514_v50, %v998_v44, %v3561_v48  ;;  %v737_v31 = vand.u32 3, %v736_v58  ;;  %v991_v2 = vsel %vm987_vm15, %v971_v8, %v974_v32 }
 0x1bf   : > { %v1543_v36 = vclz %v2274_v7  ;;  %v993_v27 = vsel %vm989_vm2, %v977_v26, %v992_v24  ;;  %v1001_v61 = vsel %vm989_vm2, %v983_v52, %v1000_v53  ;;  %v1790_v30 = vand.u32 2139095040, %v3534_v45 }
 0x1c0   : > { %vm3576_vm3 = vcmp.le.f32.partialorder %v1475_v0, 0.7853982  ;;  %vm1477_vm4 = vcmp.lt.s32.totalorder %v3356_v1, 0  ;;  %v1002_v20 = vsel %vm988_vm1, %v999_v25, %v1001_v61  ;;  %v1787_v34 = vand.u32 2147483647, %v3534_v45 }
 0x1c1   : > { %v2275_v14 = vadd.s32 4294967294, %v1543_v36  ;;  %v1562_v49 = vsel %vm1477_vm4, %v1561_v39, %v1537_v41  ;;  %v3586_v6 = vmul.u32.u64.low %v3514_v50, %v1002_v20  ;;  %v3587_v23 = vmul.u32.u64.high %v3514_v50, %v1002_v20, %v3586_v6 }
 0x1c2   : > { %vm735_vm5 = vweird.f32 %v3182_v21  ;;  %v994_v0 = vsel %vm988_vm1, %v991_v2, %v993_v27  ;;  %v1013_v55 = vadd.s32 1, %v3562_v18  ;;  %v1791_v60 = vshrl.u32 %v1790_v30, 23 }
 0x1c3   : > { %vm2276_vm6 = vcmp.lt.s32.totalorder %v2275_v14, 0  ;;  %vm738_vm7 = vcmp.lt.s32.totalorder %v737_v31, 2  ;;  %vm742_vm8 = vcmp.eq.s32.totalorder %v737_v31, 2  ;;  %v1531_v41 = vadd.s32 %v3475_v29, %v3481_v10 }
 0x1c4   : > { %v1546_v58 = vsel %vm2276_vm6, 0, %v2275_v14  ;;  %v1564_v26 = vsel %vm3576_vm3, 0, %v1562_v49  ;;  %v2285_v54 = vadd.s32 4294967169, %v1791_v60  ;;  %v1010_v38 = vmul.u32 %v3514_v50, %v994_v0 }
 0x1c5   : > { %v1547_v4 = vsub.s32 32, %v1546_v58  ;;  %v1551_v32 = vsub.s32 4294967266, %v1546_v58  ;;  %v1548_v52 = vshll.u32 %v3528_v28, %v1546_v58  ;;  %vm1012_vm9 = vc.u32 %v3587_v23, %v3561_v48 }
 0x1c6   : > { %v2546_v47 = vpop.eup %2545  ;;  %v1794_v3 = vand.u32 8388607, %v1787_v34  ;;  %v1014_v40 = vsel %vm1012_vm9, %v1013_v55, %v3562_v18  ;;  %v1797_v33 = vadd.s32 1, %v2285_v54  ;;  %v3607_v28 = vadd.f32 %v3352_v17, %v3147_v62 }
 0x1c7   : > { %v2548_v57 = vpop.eup %2547  ;;  %v743_v29 = vxor.u32 2147483648, %v2546_v47  ;;  %v1549_v10 = vshrl.u32 %v1531_v41, %v1547_v4  ;;  %v1552_v46 = vadd.s32 127, %v1551_v32  ;;  %v1015_v37 = vadd.s32 %v1014_v40, %v1010_v38 }
 0x1c8   : > { %v740_v12 = vxor.u32 2147483648, %v2548_v57  ;;  %vm739_vm10 = vcmp.eq.s32.totalorder %v737_v31, 0  ;;  %v1568_v7 = vadd.s32 3, %v1564_v26  ;;  %vm1798_vm11 = vcmp.gt.s32.totalorder %v1797_v33, 0 }
 0x1c9   : > { %v744_v50 = vsel %vm742_vm8, %v743_v29, %v2548_v57  ;;  %v1550_v39 = vor.u32 %v1549_v10, %v1548_v52  ;;  %v1553_v8 = vshll.u32 %v1552_v46, 23  ;;  %v1016_v24 = vadd.s32 536870912, %v1015_v37 }
 0x1ca   : > { %v741_v51 = vsel %vm739_vm10, %v2546_v47, %v740_v12  ;;  %v1795_v53 = vor.u32 8388608, %v1794_v3  ;;  %v1799_v18 = vsel %vm1798_vm11, %v1797_v33, 0  ;;  %v854_v27 = vand.u32 2139095040, %v3607_v28 }
 0x1cb   : > { %v745_v44 = vsel %vm738_vm7, %v741_v51, %v744_v50  ;;  %v1554_v25 = vor.u32 4788187, %v1553_v8  ;;  %v1017_v62 = vshrl.u32 %v1016_v24, 30  ;;  %v1801_v2 = vand.u32 31, %v1799_v18 }
 0x1cc   : > { %v746_v36 = vsel %vm735_vm5, nan, %v745_v44  ;;  %v1557_v30 = vcvt.s32.f32 %v1550_v39  ;;  %vm957_vm12 = vcmp.lt.s32.totalorder %v3360_v42, 0  ;;  %v3616_v14 = vand.u32 3, %v1568_v7 }
 0x1cd   : > { %2101 = vst [vmem:[%s3138_s9 + $0x10] sm:$0xff] %v746_v36  ;;  %v1555_v61 = vand.u32 2147483647, %v1554_v25  ;;  %vm3620_vm13 = vcmp.le.f32.partialorder %v955_v35, 0.7853982  ;;  %v1018_v20 = vshll.u32 %v1017_v62, 30  ;;  %v1011_v0 = vadd.s32 %v3561_v48, %v3587_v23 }
 0x1ce   : > { %v1802_v21 = vsub.s32 32, %v1801_v2  ;;  %v851_v49 = vand.u32 2147483647, %v3607_v28  ;;  %v1041_v55 = vsub.s32 4, %v1017_v62  ;;  %v3627_v60 = vshll.u32 %v1795_v53, 8 }
 0x1cf   : > { %v1558_v6 = vmul.f32 %v1557_v30, %v1555_v61  ;;  %v3629_v41 = vsub.s32 %v1015_v37, %v1018_v20  ;;  %v3631_v58 = vshrl.u32 %v1799_v18, 5  ;;  %v855_v4 = vshrl.u32 %v854_v27, 23 }
 0x1d0   : > { %v1805_v35 = vshrl.u32 %v2668_v9, %v1802_v21  ;;  %v1804_v26 = vshll.u32 %v2667_v5, %v1801_v2  ;;  %v1808_v54 = vshrl.u32 %v2669_v11, %v1802_v21  ;;  %v1811_v47 = vshrl.u32 %v2670_v13, %v1802_v21 }
 0x1d1   : > { %v1559_v32 = vxor.u32 2147483648, %v1558_v6  ;;  %v1021_v52 = vsub.s32 0, %v3629_v41  ;;  %v1807_v48 = vshll.u32 %v2668_v9, %v1801_v2  ;;  %v1810_v23 = vshll.u32 %v2669_v11, %v1801_v2 }
 0x1d2   : > { %v1814_v38 = vshrl.u32 %v2671_v15, %v1802_v21  ;;  %v1042_v57 = vsel %vm957_vm12, %v1041_v55, %v1017_v62  ;;  %v1806_v29 = vor.u32 %v1805_v35, %v1804_v26  ;;  %v1813_v10 = vshll.u32 %v2670_v13, %v1801_v2 }
 0x1d3   : > { %v1560_v3 = vsel %vm1477_vm4, %v1559_v32, %v1558_v6  ;;  %v2254_v40 = vmin.u32 %v1021_v52, %v3629_v41  ;;  %v1809_v12 = vor.u32 %v1808_v54, %v1807_v48  ;;  %v1812_v37 = vor.u32 %v1811_v47, %v1810_v23 }
 0x1d4   : > { %v1563_v46 = vsel %vm3576_vm3, %v3356_v1, %v1560_v3  ;;  %v1815_v33 = vor.u32 %v1814_v38, %v1813_v10  ;;  %v1816_v50 = vshll.u32 %v2671_v15, %v1801_v2  ;;  %v1817_v39 = vshrl.u32 %v2672_v22, %v1802_v21 }
 0x1d5   : > { %2549 = vcosq.f32 %v1563_v46  ;;  %v1023_v8 = vclz %v2254_v40  ;;  %v2249_v51 = vadd.s32 4294967169, %v855_v4  ;;  %v3654_v7 = vand.u32 8388607, %v851_v49 }
 0x1d6   : > { %2551 = vsinq.f32 %v1563_v46  ;;  %v1044_v63 = vsel %vm3620_vm13, 0, %v1042_v57  ;;  %v1803_v24 = vshrl.u32 %v2667_v5, %v1802_v21  ;;  %v1818_v44 = vor.u32 %v1817_v39, %v1816_v50 }
 0x1d7   : > { %vm1819_vm14 = vcmp.lt.s32.totalorder %v3631_v58, 1  ;;  %v2255_v25 = vadd.s32 4294967294, %v1023_v8  ;;  %vm1821_vm15 = vcmp.lt.s32.totalorder %v3631_v58, 3  ;;  %vm1822_vm0 = vcmp.lt.s32.totalorder %v3631_v58, 4 }
 0x1d8   : > { %v1827_v53 = vsel %vm1819_vm14, %v1806_v29, %v1809_v12  ;;  %v1824_v18 = vsel %vm1822_vm0, %v1812_v37, 2102212464  ;;  %v1828_v36 = vsel %vm1822_vm0, %v1815_v33, 920167782  ;;  %v1831_v62 = vsel %vm1819_vm14, %v1809_v12, %v1812_v37 }
 0x1d9   : > { %v1832_v2 = vsel %vm1822_vm0, %v1818_v44, 1326507024  ;;  %vm2256_vm1 = vcmp.lt.s32.totalorder %v2255_v25, 0  ;;  %vm1820_vm2 = vcmp.lt.s32.totalorder %v3631_v58, 2  ;;  %v1829_v27 = vsel %vm1821_vm15, %v1812_v37, %v1828_v36 }
 0x1da   : > { %v1833_v61 = vsel %vm1821_vm15, %v1815_v33, %v1832_v2  ;;  %vm1570_vm3 = vcmp.lt.s32.totalorder %v3616_v14, 2  ;;  %v1026_v30 = vsel %vm2256_vm1, 0, %v2255_v25  ;;  %v1823_v20 = vsel %vm1819_vm14, %v1803_v24, %v1806_v29 }
 0x1db   : > { %v1830_v21 = vsel %vm1820_vm2, %v1827_v53, %v1829_v27  ;;  %v1834_v6 = vsel %vm1820_vm2, %v1831_v62, %v1833_v61  ;;  %vm1567_vm4 = vweird.f32 %v3356_v1  ;;  %v1027_v55 = vsub.s32 32, %v1026_v30 }
 0x1dc   : > { %v1031_v35 = vsub.s32 4294967266, %v1026_v30  ;;  %v1825_v4 = vsel %vm1821_vm15, %v1809_v12, %v1824_v18  ;;  %v861_v32 = vadd.s32 1, %v2249_v51  ;;  %v1028_v48 = vshll.u32 %v3629_v41, %v1026_v30 }
 0x1dd   : > { %v3676_v26 = vmul.u32.u64.low %v3627_v60, %v1834_v6  ;;  %v3677_v54 = vmul.u32.u64.high %v3627_v60, %v1834_v6, %v3676_v26  ;;  %v3680_v47 = vmul.u32.u64.low %v3627_v60, %v1830_v21  ;;  %v3681_v52 = vmul.u32.u64.high %v3627_v60, %v1830_v21, %v3680_v47 }
 0x1de   : > { %v1029_v23 = vshrl.u32 %v1011_v0, %v1027_v55  ;;  %v1032_v38 = vadd.s32 127, %v1031_v35  ;;  %vm862_vm5 = vcmp.gt.s32.totalorder %v861_v32, 0  ;;  %vm1571_vm6 = vcmp.eq.s32.totalorder %v3616_v14, 0 }
 0x1df   : > { %v2550_v3 = vpop.eup %2549  ;;  %vm1574_vm7 = vcmp.eq.s32.totalorder %v3616_v14, 2  ;;  %v1826_v57 = vsel %vm1820_vm2, %v1823_v20, %v1825_v4  ;;  %v863_v29 = vsel %vm862_vm5, %v861_v32, 0  ;;  %v859_v37 = vor.u32 8388608, %v3654_v7 }
 0x1e0   : > { %v2552_v10 = vpop.eup %2551  ;;  %v1575_v46 = vxor.u32 2147483648, %v2550_v3  ;;  %v1030_v40 = vor.u32 %v1029_v23, %v1028_v48  ;;  %v1033_v12 = vshll.u32 %v1032_v38, 23  ;;  %v1048_v41 = vadd.s32 3, %v1044_v63 }
 0x1e1   : > { %v1572_v33 = vxor.u32 2147483648, %v2552_v10  ;;  %vm1844_vm8 = vc.u32 %v3677_v54, %v3680_v47  ;;  %v1845_v0 = vadd.s32 1, %v3681_v52  ;;  %v1842_v58 = vmul.u32 %v3627_v60, %v1826_v57 }
 0x1e2   : > { %v1576_v50 = vsel %vm1574_vm7, %v1575_v46, %v2552_v10  ;;  %v1034_v39 = vor.u32 4788187, %v1033_v12  ;;  %v865_v8 = vand.u32 31, %v863_v29  ;;  %v1037_v24 = vcvt.s32.f32 %v1030_v40 }
 0x1e3   : > { %v1573_v51 = vsel %vm1571_vm6, %v2550_v3, %v1572_v33  ;;  %v1846_v44 = vsel %vm1844_vm8, %v1845_v0, %v3681_v52  ;;  %v3699_v7 = vadd.f32 %v3352_v17, %v3214_v56  ;;  %v3705_v36 = vand.u32 3, %v1048_v41 }
 0x1e4   : > { %v1577_v63 = vsel %vm1570_vm3, %v1573_v51, %v1576_v50  ;;  %v1035_v25 = vand.u32 2147483647, %v1034_v39  ;;  %v1847_v53 = vadd.s32 %v1846_v44, %v1842_v58  ;;  %v866_v18 = vsub.s32 32, %v865_v8 }
 0x1e5   : > { %v1578_v60 = vsel %vm1567_vm4, nan, %v1577_v63  ;;  %v864_v62 = vshrl.u32 %v863_v29, 5  ;;  %v868_v2 = vshll.u32 %v2667_v5, %v865_v8  ;;  %v871_v30 = vshll.u32 %v2668_v9, %v865_v8 }
 0x1e6   : > { %2109 = vst [vmem:[%s3138_s9 + $0x50] sm:$0xff] %v1578_v60  ;;  %v1038_v27 = vmul.f32 %v1037_v24, %v1035_v25  ;;  %v1848_v61 = vadd.s32 536870912, %v1847_v53  ;;  %v869_v56 = vshrl.u32 %v2668_v9, %v866_v18  ;;  %v872_v14 = vshrl.u32 %v2669_v11, %v866_v18 }
 0x1e7   : > { %v874_v20 = vshll.u32 %v2669_v11, %v865_v8  ;;  %v875_v21 = vshrl.u32 %v2670_v13, %v866_v18  ;;  %v878_v1 = vshrl.u32 %v2671_v15, %v866_v18  ;;  %v877_v4 = vshll.u32 %v2670_v13, %v865_v8 }
 0x1e8   : > { %v1039_v6 = vxor.u32 2147483648, %v1038_v27  ;;  %v1849_v55 = vshrl.u32 %v1848_v61, 30  ;;  %v870_v35 = vor.u32 %v869_v56, %v868_v2  ;;  %v873_v32 = vor.u32 %v872_v14, %v871_v30 }
 0x1e9   : > { %v876_v26 = vor.u32 %v875_v21, %v874_v20  ;;  %v880_v52 = vshll.u32 %v2671_v15, %v865_v8  ;;  %v881_v48 = vshrl.u32 %v2672_v22, %v866_v18  ;;  %v879_v3 = vor.u32 %v878_v1, %v877_v4 }
 0x1ea   : > { %v1040_v23 = vsel %vm957_vm12, %v1039_v6, %v1038_v27  ;;  %v1850_v38 = vshll.u32 %v1849_v55, 30  ;;  %v3720_v57 = vshll.u32 %v859_v37, 8  ;;  %vm883_vm9 = vcmp.lt.s32.totalorder %v864_v62, 1 }
 0x1eb   : > { %v1043_v29 = vsel %vm3620_vm13, %v3360_v42, %v1040_v23  ;;  %v882_v10 = vor.u32 %v881_v48, %v880_v52  ;;  %v1686_v46 = vand.u32 2139095040, %v3699_v7  ;;  %vm884_vm10 = vcmp.lt.s32.totalorder %v864_v62, 2 }
 0x1ec   : > { %2553 = vcosq.f32 %v1043_v29  ;;  %v3726_v40 = vsub.s32 %v1847_v53, %v1850_v38  ;;  %vm886_vm11 = vcmp.lt.s32.totalorder %v864_v62, 4  ;;  %v867_v12 = vshrl.u32 %v2667_v5, %v866_v18 }
 0x1ed   : > { %2555 = vsinq.f32 %v1043_v29  ;;  %v888_v33 = vsel %vm886_vm11, %v876_v26, 2102212464  ;;  %v891_v37 = vsel %vm883_vm9, %v870_v35, %v873_v32  ;;  %v1873_v0 = vsub.s32 4, %v1849_v55 }
 0x1ee   : > { %v1853_v41 = vsub.s32 0, %v3726_v40  ;;  %vm885_vm12 = vcmp.lt.s32.totalorder %v864_v62, 3  ;;  %v892_v31 = vsel %vm886_vm11, %v879_v3, 920167782  ;;  %v887_v50 = vsel %vm883_vm9, %v867_v12, %v870_v35 }
 0x1ef   : > { %v893_v39 = vsel %vm885_vm12, %v876_v26, %v892_v31  ;;  %v895_v58 = vsel %vm883_vm9, %v873_v32, %v876_v26  ;;  %v896_v8 = vsel %vm886_vm11, %v882_v10, 1326507024  ;;  %v889_v24 = vsel %vm885_vm12, %v873_v32, %v888_v33 }
 0x1f0   : > { %v2286_v51 = vmin.u32 %v1853_v41, %v3726_v40  ;;  %v894_v44 = vsel %vm884_vm10, %v891_v37, %v893_v39  ;;  %v897_v63 = vsel %vm885_vm12, %v879_v3, %v896_v8  ;;  %vm1789_vm13 = vcmp.lt.s32.totalorder %v3534_v45, 0 }
 0x1f1   : > { %v898_v25 = vsel %vm884_vm10, %v895_v58, %v897_v63  ;;  %v3738_v53 = vmul.u32.u64.low %v3720_v57, %v894_v44  ;;  %v3739_v18 = vmul.u32.u64.high %v3720_v57, %v894_v44, %v3738_v53  ;;  %v1874_v2 = vsel %vm1789_vm13, %v1873_v0, %v1849_v55 }
 0x1f2   : > { %v1855_v60 = vclz %v2286_v51  ;;  %v1683_v27 = vand.u32 2147483647, %v3699_v7  ;;  %v890_v61 = vsel %vm884_vm10, %v887_v50, %v889_v24  ;;  %v1687_v14 = vshrl.u32 %v1686_v46, 23 }
 0x1f3   : > { %v3746_v56 = vmul.u32.u64.low %v3720_v57, %v898_v25  ;;  %v3747_v30 = vmul.u32.u64.high %v3720_v57, %v898_v25, %v3746_v56  ;;  %vm1050_vm14 = vcmp.lt.s32.totalorder %v3705_v36, 2  ;;  %vm3752_vm15 = vcmp.le.f32.partialorder %v1787_v34, 0.7853982 }
 0x1f4   : > { %v2287_v21 = vadd.s32 4294967294, %v1855_v60  ;;  %v3758_v1 = vadd.f32 %v3352_v17, %v3341_v59  ;;  %vm1051_vm0 = vcmp.eq.s32.totalorder %v3705_v36, 0  ;;  %vm1054_vm1 = vcmp.eq.s32.totalorder %v3705_v36, 2 }
 0x1f5   : > { %v909_v62 = vadd.s32 1, %v3739_v18  ;;  %v2281_v6 = vadd.s32 4294967169, %v1687_v14  ;;  %v1843_v35 = vadd.s32 %v3680_v47, %v3677_v54  ;;  %v1876_v34 = vsel %vm3752_vm15, 0, %v1874_v2 }
 0x1f6   : > { %v2554_v55 = vpop.eup %2553  ;;  %vm2288_vm2 = vcmp.lt.s32.totalorder %v2287_v21, 0  ;;  %v906_v4 = vmul.u32 %v3720_v57, %v890_v61  ;;  %vm908_vm3 = vc.u32 %v3747_v30, %v3738_v53  ;;  %v1690_v26 = vand.u32 8388607, %v1683_v27 }
 0x1f7   : > { %v2556_v32 = vpop.eup %2555  ;;  %v1055_v59 = vxor.u32 2147483648, %v2554_v55  ;;  %v1858_v17 = vsel %vm2288_vm2, 0, %v2287_v21  ;;  %v1166_v38 = vand.u32 2139095040, %v3758_v1  ;;  %v910_v3 = vsel %vm908_vm3, %v909_v62, %v3739_v18 }
 0x1f8   : > { %v1052_v52 = vxor.u32 2147483648, %v2556_v32  ;;  %v1859_v48 = vsub.s32 32, %v1858_v17  ;;  %v1863_v23 = vsub.s32 4294967266, %v1858_v17  ;;  %v1860_v47 = vshll.u32 %v3726_v40, %v1858_v17 }
 0x1f9   : > { %v1056_v54 = vsel %vm1054_vm1, %v1055_v59, %v2556_v32  ;;  %v1693_v57 = vadd.s32 1, %v2281_v6  ;;  %v911_v12 = vadd.s32 %v910_v3, %v906_v4  ;;  %vm1047_vm4 = vweird.f32 %v3360_v42 }
 0x1fa   : > { %v1053_v29 = vsel %vm1051_vm0, %v2554_v55, %v1052_v52  ;;  %v1861_v10 = vshrl.u32 %v1843_v35, %v1859_v48  ;;  %v1864_v46 = vadd.s32 127, %v1863_v23  ;;  %v1880_v37 = vadd.s32 3, %v1876_v34 }
 0x1fb   : > { %v1057_v33 = vsel %vm1050_vm14, %v1053_v29, %v1056_v54  ;;  %vm1694_vm5 = vcmp.gt.s32.totalorder %v1693_v57, 0  ;;  %v912_v40 = vadd.s32 536870912, %v911_v12  ;;  %v1691_v50 = vor.u32 8388608, %v1690_v26 }
 0x1fc   : > { %v1058_v41 = vsel %vm1047_vm4, nan, %v1057_v33  ;;  %v1862_v0 = vor.u32 %v1861_v10, %v1860_v47  ;;  %v1865_v31 = vshll.u32 %v1864_v46, 23  ;;  %v1695_v39 = vsel %vm1694_vm5, %v1693_v57, 0 }
 0x1fd   : > { %2104 = vst [vmem:[%s3138_s9 + $0x28] sm:$0xff] %v1058_v41  ;;  %v913_v8 = vshrl.u32 %v912_v40, 30  ;;  %v1167_v51 = vshrl.u32 %v1166_v38, 23  ;;  %v1697_v24 = vand.u32 31, %v1695_v39  ;;  %v3782_v25 = vand.u32 3, %v1880_v37 }
 0x1fe   : > { %v1866_v58 = vor.u32 4788187, %v1865_v31  ;;  %v1869_v63 = vcvt.s32.f32 %v1862_v0  ;;  %vm853_vm6 = vcmp.lt.s32.totalorder %v3607_v28, 0  ;;  %v907_v36 = vadd.s32 %v3738_v53, %v3747_v30 }
 0x1ff   : > { %v914_v42 = vshll.u32 %v913_v8, 30  ;;  %v1698_v18 = vsub.s32 32, %v1697_v24  ;;  %v3786_v60 = vshll.u32 %v1691_v50, 8  ;;  %v1163_v2 = vand.u32 2147483647, %v3758_v1 }
 0x200   : > { %v1867_v44 = vand.u32 2147483647, %v1866_v58  ;;  %v1696_v14 = vshrl.u32 %v1695_v39, 5  ;;  %v2261_v21 = vadd.s32 4294967169, %v1167_v51  ;;  %v937_v62 = vsub.s32 4, %v913_v8 }
 0x201   : > { %v3789_v56 = vsub.s32 %v911_v12, %v914_v42  ;;  %v1700_v6 = vshll.u32 %v2667_v5, %v1697_v24  ;;  %v1701_v55 = vshrl.u32 %v2668_v9, %v1698_v18  ;;  %v1704_v35 = vshrl.u32 %v2669_v11, %v1698_v18 }
 0x202   : > { %v1870_v61 = vmul.f32 %v1869_v63, %v1867_v44  ;;  %vm3796_vm7 = vcmp.le.f32.partialorder %v851_v49, 0.7853982  ;;  %v1703_v4 = vshll.u32 %v2668_v9, %v1697_v24  ;;  %v1707_v32 = vshrl.u32 %v2670_v13, %v1698_v18 }
 0x203   : > { %v917_v30 = vsub.s32 0, %v3789_v56  ;;  %v1702_v59 = vor.u32 %v1701_v55, %v1700_v6  ;;  %v1706_v17 = vshll.u32 %v2669_v11, %v1697_v24  ;;  %v1709_v26 = vshll.u32 %v2670_v13, %v1697_v24 }
 0x204   : > { %v1871_v34 = vxor.u32 2147483648, %v1870_v61  ;;  %v1710_v52 = vshrl.u32 %v2671_v15, %v1698_v18  ;;  %v1705_v23 = vor.u32 %v1704_v35, %v1703_v4  ;;  %v1712_v38 = vshll.u32 %v2671_v15, %v1697_v24 }
 0x205   : > { %v2250_v49 = vmin.u32 %v917_v30, %v3789_v56  ;;  %v1708_v47 = vor.u32 %v1707_v32, %v1706_v17  ;;  %v1713_v57 = vshrl.u32 %v2672_v22, %v1698_v18  ;;  %vm1715_vm8 = vcmp.lt.s32.totalorder %v1696_v14, 1 }
 0x206   : > { %v1872_v48 = vsel %vm1789_vm13, %v1871_v34, %v1870_v61  ;;  %v1711_v3 = vor.u32 %v1710_v52, %v1709_v26  ;;  %v1173_v10 = vadd.s32 1, %v2261_v21  ;;  %v938_v46 = vsel %vm853_vm6, %v937_v62, %v913_v8 }
 0x207   : > { %v1875_v54 = vsel %vm3752_vm15, %v3534_v45, %v1872_v48  ;;  %v919_v29 = vclz %v2250_v49  ;;  %v1699_v12 = vshrl.u32 %v2667_v5, %v1698_v18  ;;  %v1714_v33 = vor.u32 %v1713_v57, %v1712_v38 }
 0x208   : > { %2557 = vcosq.f32 %v1875_v54  ;;  %vm1717_vm9 = vcmp.lt.s32.totalorder %v1696_v14, 3  ;;  %vm1718_vm10 = vcmp.lt.s32.totalorder %v1696_v14, 4  ;;  %v1723_v20 = vsel %vm1715_vm8, %v1702_v59, %v1705_v23 }
 0x209   : > { %2559 = vsinq.f32 %v1875_v54  ;;  %v2251_v37 = vadd.s32 4294967294, %v919_v29  ;;  %v1720_v41 = vsel %vm1718_vm10, %v1708_v47, 2102212464  ;;  %v1724_v0 = vsel %vm1718_vm10, %v1711_v3, 920167782 }
 0x20a   : > { %v1727_v31 = vsel %vm1715_vm8, %v1705_v23, %v1708_v47  ;;  %v1728_v40 = vsel %vm1718_vm10, %v1714_v33, 1326507024  ;;  %vm1716_vm12 = vcmp.lt.s32.totalorder %v1696_v14, 2  ;;  %v1725_v50 = vsel %vm1717_vm9, %v1708_v47, %v1724_v0  ;;  %v3852_v29 = vld [vmem:[%s4210_s2] ss:$0 sm:$0xff] }
 0x20b   : > { %vm2252_vm11 = vcmp.lt.s32.totalorder %v2251_v37, 0  ;;  %v1729_v39 = vsel %vm1717_vm9, %v1711_v3, %v1728_v40  ;;  %v940_v8 = vsel %vm3796_vm7, 0, %v938_v46  ;;  %v1726_v51 = vsel %vm1716_vm12, %v1723_v20, %v1725_v50 }
 0x20c   : > { %v922_v58 = vsel %vm2252_vm11, 0, %v2251_v37  ;;  %v1730_v24 = vsel %vm1716_vm12, %v1727_v31, %v1729_v39  ;;  %vm1882_vm13 = vcmp.lt.s32.totalorder %v3782_v25, 2  ;;  %v1719_v42 = vsel %vm1715_vm8, %v1699_v12, %v1702_v59 }
 0x20d   : > { %v923_v44 = vsub.s32 32, %v922_v58  ;;  %v927_v63 = vsub.s32 4294967266, %v922_v58  ;;  %v1721_v18 = vsel %vm1717_vm9, %v1705_v23, %v1720_v41  ;;  %vm1879_vm14 = vweird.f32 %v3534_v45 }
 0x20e   : > { %v3830_v61 = vmul.u32.u64.low %v3786_v60, %v1730_v24  ;;  %v3831_v21 = vmul.u32.u64.high %v3786_v60, %v1730_v24, %v3830_v61  ;;  %v3834_v62 = vmul.u32.u64.low %v3786_v60, %v1726_v51  ;;  %v3835_v6 = vmul.u32.u64.high %v3786_v60, %v1726_v51, %v3834_v62 }
 0x20f   : > { %v924_v55 = vshll.u32 %v3789_v56, %v922_v58  ;;  %v925_v35 = vshrl.u32 %v907_v36, %v923_v44  ;;  %v928_v34 = vadd.s32 127, %v927_v63  ;;  %vm1174_vm15 = vcmp.gt.s32.totalorder %v1173_v10, 0 }
 0x210   : > { %vm1883_vm0 = vcmp.eq.s32.totalorder %v3782_v25, 0  ;;  %v1722_v30 = vsel %vm1716_vm12, %v1719_v42, %v1721_v18  ;;  %v1170_v4 = vand.u32 8388607, %v1163_v2  ;;  %v1175_v32 = vsel %vm1174_vm15, %v1173_v10, 0 }
 0x211   : > { %vm1886_vm1 = vcmp.eq.s32.totalorder %v3782_v25, 2  ;;  %v926_v17 = vor.u32 %v925_v35, %v924_v55  ;;  %v929_v26 = vshll.u32 %v928_v34, 23  ;;  %v1177_v52 = vand.u32 31, %v1175_v32 }
 0x212   : > { %v2558_v59 = vpop.eup %2557  ;;  %v944_v56 = vadd.s32 3, %v940_v8  ;;  %vm1740_vm2 = vc.u32 %v3831_v21, %v3834_v62  ;;  %v1741_v36 = vadd.s32 1, %v3835_v6  ;;  %v1738_v38 = vmul.u32 %v3786_v60, %v1722_v30 }
 0x213   : > { %v2560_v48 = vpop.eup %2559  ;;  %v1887_v49 = vxor.u32 2147483648, %v2558_v59  ;;  %v930_v23 = vor.u32 4788187, %v929_v26  ;;  %v1178_v54 = vsub.s32 32, %v1177_v52  ;;  %v1171_v57 = vor.u32 8388608, %v1170_v4 }
 0x214   : > { %v1884_v14 = vxor.u32 2147483648, %v2560_v48  ;;  %v1742_v3 = vsel %vm1740_vm2, %v1741_v36, %v3835_v6  ;;  %v3856_v10 = vadd.f32 %v3852_v29, %v3390_v19  ;;  %v933_v60 = vcvt.s32.f32 %v926_v17 }
 0x215   : > { %v1888_v47 = vsel %vm1886_vm1, %v1887_v49, %v2560_v48  ;;  %v931_v12 = vand.u32 2147483647, %v930_v23  ;;  %v1743_v33 = vadd.s32 %v1742_v3, %v1738_v38  ;;  %v3862_v20 = vand.u32 3, %v944_v56 }
 0x216   : > { %v1885_v46 = vsel %vm1883_vm0, %v2558_v59, %v1884_v14  ;;  %v1181_v41 = vshrl.u32 %v2668_v9, %v1178_v54  ;;  %v1184_v0 = vshrl.u32 %v2669_v11, %v1178_v54  ;;  %v1176_v50 = vshrl.u32 %v1175_v32, 5 }
 0x217   : > { %v1889_v37 = vsel %vm1882_vm13, %v1885_v46, %v1888_v47  ;;  %v934_v19 = vmul.f32 %v933_v60, %v931_v12  ;;  %v1744_v40 = vadd.s32 536870912, %v1743_v33  ;;  %vm1685_vm3 = vcmp.lt.s32.totalorder %v3699_v7, 0 }
 0x218   : > { %v1890_v31 = vsel %vm1879_vm14, nan, %v1889_v37  ;;  %v1180_v39 = vshll.u32 %v2667_v5, %v1177_v52  ;;  %v1183_v25 = vshll.u32 %v2668_v9, %v1177_v52  ;;  %v1187_v58 = vshrl.u32 %v2670_v13, %v1178_v54 }
 0x219   : > { %2112 = vst [vmem:[%s3138_s9 + $0x68] sm:$0xff] %v1890_v31  ;;  %v1190_v8 = vshrl.u32 %v2671_v15, %v1178_v54  ;;  %v935_v51 = vxor.u32 2147483648, %v934_v19  ;;  %v1745_v24 = vshrl.u32 %v1744_v40, 30  ;;  %v1186_v44 = vshll.u32 %v2669_v11, %v1177_v52 }
 0x21a   : > { %v1189_v45 = vshll.u32 %v2670_v13, %v1177_v52  ;;  %v1182_v63 = vor.u32 %v1181_v41, %v1180_v39  ;;  %v1185_v42 = vor.u32 %v1184_v0, %v1183_v25  ;;  %v1192_v18 = vshll.u32 %v2671_v15, %v1177_v52 }
 0x21b   : > { %v1193_v61 = vshrl.u32 %v2672_v22, %v1178_v54  ;;  %v936_v6 = vsel %vm853_vm6, %v935_v51, %v934_v19  ;;  %v1746_v55 = vshll.u32 %v1745_v24, 30  ;;  %v3880_v34 = vshll.u32 %v1171_v57, 8 }
 0x21c   : > { %v1191_v35 = vor.u32 %v1190_v8, %v1189_v45  ;;  %v939_v30 = vsel %vm3796_vm7, %v3607_v28, %v936_v6  ;;  %v1188_v4 = vor.u32 %v1187_v58, %v1186_v44  ;;  %v1998_v59 = vand.u32 2139095040, %v3856_v10 }
 0x21d   : > { %v1194_v32 = vor.u32 %v1193_v61, %v1192_v18  ;;  %2561 = vcosq.f32 %v939_v30  ;;  %v3886_v17 = vsub.s32 %v1743_v33, %v1746_v55  ;;  %v1769_v26 = vsub.s32 4, %v1745_v24 }
 0x21e   : > { %vm1195_vm4 = vcmp.lt.s32.totalorder %v1176_v50, 1  ;;  %2563 = vsinq.f32 %v939_v30  ;;  %v1179_v52 = vshrl.u32 %v2667_v5, %v1178_v54  ;;  %vm1198_vm5 = vcmp.lt.s32.totalorder %v1176_v50, 4 }
 0x21f   : > { %v1203_v48 = vsel %vm1195_vm4, %v1182_v63, %v1185_v42  ;;  %v1749_v49 = vsub.s32 0, %v3886_v17  ;;  %vm1196_vm6 = vcmp.lt.s32.totalorder %v1176_v50, 2  ;;  %vm1197_vm8 = vcmp.lt.s32.totalorder %v1176_v50, 3 }
 0x220   : > { %v1204_v53 = vsel %vm1198_vm5, %v1191_v35, 920167782  ;;  %v1200_v56 = vsel %vm1198_vm5, %v1188_v4, 2102212464  ;;  %v1207_v14 = vsel %vm1195_vm4, %v1185_v42, %v1188_v4  ;;  %v1208_v23 = vsel %vm1198_vm5, %v1194_v32, 1326507024 }
 0x221   : > { %v1205_v36 = vsel %vm1197_vm8, %v1188_v4, %v1204_v53  ;;  %v2282_v38 = vmin.u32 %v1749_v49, %v3886_v17  ;;  %v1770_v47 = vsel %vm1685_vm3, %v1769_v26, %v1745_v24  ;;  %v1209_v3 = vsel %vm1197_vm8, %v1191_v35, %v1208_v23 }
 0x222   : > { %v1206_v54 = vsel %vm1196_vm6, %v1203_v48, %v1205_v36  ;;  %v1210_v57 = vsel %vm1196_vm6, %v1207_v14, %v1209_v3  ;;  %v1999_v60 = vshrl.u32 %v1998_v59, 23  ;;  %v1199_v37 = vsel %vm1195_vm4, %v1179_v52, %v1182_v63 }
 0x223   : > { %v3898_v46 = vmul.u32.u64.low %v3880_v34, %v1206_v54  ;;  %v3899_v12 = vmul.u32.u64.high %v3880_v34, %v1206_v54, %v3898_v46  ;;  %v1751_v33 = vclz %v2282_v38  ;;  %v1201_v41 = vsel %vm1197_vm8, %v1185_v42, %v1200_v56 }
 0x224   : > { %vm943_vm7 = vweird.f32 %v3607_v28  ;;  %vm3905_vm9 = vcmp.le.f32.partialorder %v1683_v27, 0.7853982  ;;  %v3910_v31 = vmul.u32.u64.low %v3880_v34, %v1210_v57  ;;  %v3911_v19 = vmul.u32.u64.high %v3880_v34, %v1210_v57, %v3910_v31 }
 0x225   : > { %v2293_v40 = vadd.s32 4294967169, %v1999_v60  ;;  %v2283_v39 = vadd.s32 4294967294, %v1751_v33  ;;  %v1772_v25 = vsel %vm3905_vm9, 0, %v1770_v47  ;;  %v1995_v58 = vand.u32 2147483647, %v3856_v10 }
 0x226   : > { %v3918_v8 = vadd.f32 %v3852_v29, %v3483_v43  ;;  %vm946_vm10 = vcmp.lt.s32.totalorder %v3862_v20, 2  ;;  %v1202_v27 = vsel %vm1196_vm6, %v1199_v37, %v1201_v41  ;;  %v1221_v51 = vadd.s32 1, %v3899_v12 }
 0x227   : > { %v2005_v24 = vadd.s32 1, %v2293_v40  ;;  %v2562_v44 = vpop.eup %2561  ;;  %vm947_vm11 = vcmp.eq.s32.totalorder %v3862_v20, 0  ;;  %vm950_vm12 = vcmp.eq.s32.totalorder %v3862_v20, 2  ;;  %v1739_v45 = vadd.s32 %v3834_v62, %v3831_v21 }
 0x228   : > { %vm2284_vm13 = vcmp.lt.s32.totalorder %v2283_v39, 0  ;;  %v2564_v63 = vpop.eup %2563  ;;  %v951_v42 = vxor.u32 2147483648, %v2562_v44  ;;  %v1776_v18 = vadd.s32 3, %v1772_v25  ;;  %vm1220_vm14 = vc.u32 %v3911_v19, %v3898_v46 }
 0x229   : > { %v1754_v43 = vsel %vm2284_vm13, 0, %v2283_v39  ;;  %v948_v50 = vxor.u32 2147483648, %v2564_v63  ;;  %v1218_v55 = vmul.u32 %v3880_v34, %v1202_v27  ;;  %v1222_v4 = vsel %vm1220_vm14, %v1221_v51, %v3899_v12 }
 0x22a   : > { %v1755_v61 = vsub.s32 32, %v1754_v43  ;;  %v1759_v6 = vsub.s32 4294967266, %v1754_v43  ;;  %v952_v35 = vsel %vm950_vm12, %v951_v42, %v2564_v63  ;;  %v1756_v30 = vshll.u32 %v3886_v17, %v1754_v43 }
 0x22b   : > { %vm2006_vm15 = vcmp.gt.s32.totalorder %v2005_v24, 0  ;;  %v949_v21 = vsel %vm947_vm11, %v2562_v44, %v948_v50  ;;  %v1223_v59 = vadd.s32 %v1222_v4, %v1218_v55  ;;  %v2002_v52 = vand.u32 8388607, %v1995_v58 }
 0x22c   : > { %v1757_v62 = vshrl.u32 %v1739_v45, %v1755_v61  ;;  %v1760_v32 = vadd.s32 127, %v1759_v6  ;;  %v953_v26 = vsel %vm946_vm10, %v949_v21, %v952_v35  ;;  %v2007_v34 = vsel %vm2006_vm15, %v2005_v24, 0 }
 0x22d   : > { %v1059_v48 = vand.u32 2147483647, %v3918_v8  ;;  %v954_v17 = vsel %vm943_vm7, nan, %v953_v26  ;;  %v1224_v56 = vadd.s32 536870912, %v1223_v59  ;;  %v2009_v36 = vand.u32 31, %v2007_v34 }
 0x22e   : > { %v1758_v49 = vor.u32 %v1757_v62, %v1756_v30  ;;  %v1761_v53 = vshll.u32 %v1760_v32, 23  ;;  %2103 = vst [vmem:[%s3138_s9 + $0x20] sm:$0xff] %v954_v17  ;;  %v3943_v38 = vand.u32 3, %v1776_v18  ;;  %v2003_v20 = vor.u32 8388608, %v2002_v52 }
 0x22f   : > { %v3941_v23 = vshrl.u32 %v1224_v56, 30  ;;  %v2010_v47 = vsub.s32 32, %v2009_v36  ;;  %v1062_v54 = vand.u32 2139095040, %v3918_v8  ;;  %v3949_v28 = vand.u32 8388607, %v1059_v48 }
 0x230   : > { %v1762_v14 = vor.u32 4788187, %v1761_v53  ;;  %v1765_v57 = vcvt.s32.f32 %v1758_v49  ;;  %v1219_v60 = vadd.s32 %v3898_v46, %v3911_v19  ;;  %v2012_v39 = vshll.u32 %v2667_v5, %v2009_v36 }
 0x231   : > { %v1226_v12 = vshll.u32 %v3941_v23, 30  ;;  %v2013_v33 = vshrl.u32 %v2668_v9, %v2010_v47  ;;  %v2016_v37 = vshrl.u32 %v2669_v11, %v2010_v47  ;;  %v2019_v41 = vshrl.u32 %v2670_v13, %v2010_v47 }
 0x232   : > { %v1763_v3 = vand.u32 2147483647, %v1762_v14  ;;  %v2022_v25 = vshrl.u32 %v2671_v15, %v2010_v47  ;;  %v2008_v27 = vshrl.u32 %v2007_v34, 5  ;;  %v2015_v51 = vshll.u32 %v2668_v9, %v2009_v36 }
 0x233   : > { %v3955_v40 = vsub.s32 %v1223_v59, %v1226_v12  ;;  %v2018_v24 = vshll.u32 %v2669_v11, %v2009_v36  ;;  %v1063_v44 = vshrl.u32 %v1062_v54, 23  ;;  %v2014_v45 = vor.u32 %v2013_v33, %v2012_v39 }
 0x234   : > { %v1766_v31 = vmul.f32 %v1765_v57, %v1763_v3  ;;  %v2021_v63 = vshll.u32 %v2670_v13, %v2009_v36  ;;  %v2017_v42 = vor.u32 %v2016_v37, %v2015_v51  ;;  %v2024_v18 = vshll.u32 %v2671_v15, %v2009_v36 }
 0x235   : > { %v1229_v19 = vsub.s32 0, %v3955_v40  ;;  %v2020_v43 = vor.u32 %v2019_v41, %v2018_v24  ;;  %v2025_v50 = vshrl.u32 %v2672_v22, %v2010_v47  ;;  %v3968_v35 = vshll.u32 %v2003_v20, 8 }
 0x236   : > { %v1767_v46 = vxor.u32 2147483648, %v1766_v31  ;;  %v2023_v55 = vor.u32 %v2022_v25, %v2021_v63  ;;  %v2011_v4 = vshrl.u32 %v2667_v5, %v2010_v47  ;;  %v2257_v62 = vadd.s32 4294967169, %v1063_v44 }
 0x237   : > { %v2262_v6 = vmin.u32 %v1229_v19, %v3955_v40  ;;  %v2026_v21 = vor.u32 %v2025_v50, %v2024_v18  ;;  %vm2027_vm0 = vcmp.lt.s32.totalorder %v2008_v27, 1  ;;  %vm2030_vm1 = vcmp.lt.s32.totalorder %v2008_v27, 4 }
 0x238   : > { %v1768_v61 = vsel %vm1685_vm3, %v1767_v46, %v1766_v31  ;;  %vm1165_vm2 = vcmp.lt.s32.totalorder %v3758_v1, 0  ;;  %vm2028_vm3 = vcmp.lt.s32.totalorder %v2008_v27, 2  ;;  %v2032_v59 = vsel %vm2030_vm1, %v2020_v43, 2102212464 }
 0x239   : > { %v1771_v30 = vsel %vm3905_vm9, %v3699_v7, %v1768_v61  ;;  %v1231_v32 = vclz %v2262_v6  ;;  %v2035_v26 = vsel %vm2027_vm0, %v2014_v45, %v2017_v42  ;;  %vm2029_vm4 = vcmp.lt.s32.totalorder %v2008_v27, 3 }
 0x23a   : > { %2565 = vcosq.f32 %v1771_v30  ;;  %v2036_v34 = vsel %vm2030_vm1, %v2023_v55, 920167782  ;;  %v2039_v17 = vsel %vm2027_vm0, %v2017_v42, %v2020_v43  ;;  %v2031_v0 = vsel %vm2027_vm0, %v2011_v4, %v2014_v45 }
 0x23b   : > { %2567 = vsinq.f32 %v1771_v30  ;;  %v2263_v52 = vadd.s32 4294967294, %v1231_v32  ;;  %v2037_v49 = vsel %vm2029_vm4, %v2020_v43, %v2036_v34  ;;  %v2040_v53 = vsel %vm2030_vm1, %v2026_v21, 1326507024 }
 0x23c   : > { %v1069_v56 = vadd.s32 1, %v2257_v62  ;;  %v2033_v36 = vsel %vm2029_vm4, %v2017_v42, %v2032_v59  ;;  %v2038_v14 = vsel %vm2028_vm3, %v2035_v26, %v2037_v49  ;;  %v2041_v20 = vsel %vm2029_vm4, %v2023_v55, %v2040_v53 }
 0x23d   : > { %vm2264_vm5 = vcmp.lt.s32.totalorder %v2263_v52, 0  ;;  %v2042_v54 = vsel %vm2028_vm3, %v2039_v17, %v2041_v20  ;;  %v3978_v3 = vmul.u32.u64.low %v3968_v35, %v2038_v14  ;;  %v3979_v57 = vmul.u32.u64.high %v3968_v35, %v2038_v14, %v3978_v3 }
 0x23e   : > { %v1234_v47 = vsel %vm2264_vm5, 0, %v2263_v52  ;;  %v1249_v37 = vsub.s32 4, %v3941_v23  ;;  %vm1070_vm6 = vcmp.gt.s32.totalorder %v1069_v56, 0  ;;  %vm1775_vm8 = vweird.f32 %v3699_v7 }
 0x23f   : > { %v1235_v12 = vsub.s32 32, %v1234_v47  ;;  %v1239_v33 = vsub.s32 4294967266, %v1234_v47  ;;  %v2034_v41 = vsel %vm2028_vm3, %v2031_v0, %v2033_v36  ;;  %v1071_v25 = vsel %vm1070_vm6, %v1069_v56, 0 }
 0x240   : > { %v3986_v31 = vmul.u32.u64.low %v3968_v35, %v2042_v54  ;;  %v3987_v39 = vmul.u32.u64.high %v3968_v35, %v2042_v54, %v3986_v31  ;;  %v1236_v51 = vshll.u32 %v3955_v40, %v1234_v47  ;;  %v1073_v46 = vand.u32 31, %v1071_v25 }
 0x241   : > { %v1237_v24 = vshrl.u32 %v1219_v60, %v1235_v12  ;;  %v1240_v44 = vadd.s32 127, %v1239_v33  ;;  %vm1778_vm7 = vcmp.lt.s32.totalorder %v3943_v38, 2  ;;  %vm1779_vm9 = vcmp.eq.s32.totalorder %v3943_v38, 0 }
 0x242   : > { %vm3994_vm10 = vcmp.le.f32.partialorder %v1163_v2, 0.7853982  ;;  %v2053_v27 = vadd.s32 1, %v3979_v57  ;;  %vm1782_vm11 = vcmp.eq.s32.totalorder %v3943_v38, 2  ;;  %v1250_v60 = vsel %vm1165_vm2, %v1249_v37, %v3941_v23 }
 0x243   : > { %v1238_v63 = vor.u32 %v1237_v24, %v1236_v51  ;;  %v1241_v40 = vshll.u32 %v1240_v44, 23  ;;  %v2050_v18 = vmul.u32 %v3968_v35, %v2034_v41  ;;  %vm2052_vm12 = vc.u32 %v3987_v39, %v3978_v3 }
 0x244   : > { %v2566_v45 = vpop.eup %2565  ;;  %v1074_v2 = vsub.s32 32, %v1073_v46  ;;  %v2054_v6 = vsel %vm2052_vm12, %v2053_v27, %v3979_v57  ;;  %v1067_v55 = vor.u32 8388608, %v3949_v28  ;;  %v1252_v4 = vsel %vm3994_vm10, 0, %v1250_v60 }
 0x245   : > { %v2568_v42 = vpop.eup %2567  ;;  %v1783_v43 = vxor.u32 2147483648, %v2566_v45  ;;  %v1242_v61 = vor.u32 4788187, %v1241_v40  ;;  %v2055_v23 = vadd.s32 %v2054_v6, %v2050_v18  ;;  %v4012_v21 = vadd.f32 %v3852_v29, %v3565_v16 }
 0x246   : > { %v1780_v50 = vxor.u32 2147483648, %v2568_v42  ;;  %v1245_v32 = vcvt.s32.f32 %v1238_v63  ;;  %v1072_v59 = vshrl.u32 %v1071_v25, 5  ;;  %v1077_v52 = vshrl.u32 %v2668_v9, %v1074_v2 }
 0x247   : > { %v1784_v30 = vsel %vm1782_vm11, %v1783_v43, %v2568_v42  ;;  %v1243_v62 = vand.u32 2147483647, %v1242_v61  ;;  %v2056_v28 = vadd.s32 536870912, %v2055_v23  ;;  %v1080_v34 = vshrl.u32 %v2669_v11, %v1074_v2 }
 0x248   : > { %v1781_v35 = vsel %vm1779_vm9, %v2566_v45, %v1780_v50  ;;  %v1076_v16 = vshll.u32 %v2667_v5, %v1073_v46  ;;  %v1083_v29 = vshrl.u32 %v2670_v13, %v1074_v2  ;;  %v1079_v53 = vshll.u32 %v2668_v9, %v1073_v46 }
 0x249   : > { %v1785_v26 = vsel %vm1778_vm7, %v1781_v35, %v1784_v30  ;;  %v1246_v0 = vmul.f32 %v1245_v32, %v1243_v62  ;;  %v4025_v49 = vshrl.u32 %v2056_v28, 30  ;;  %v1082_v38 = vshll.u32 %v2669_v11, %v1073_v46 }
 0x24a   : > { %v1786_v17 = vsel %vm1775_vm8, nan, %v1785_v26  ;;  %v1086_v56 = vshrl.u32 %v2671_v15, %v1074_v2  ;;  %v1085_v14 = vshll.u32 %v2670_v13, %v1073_v46  ;;  %v1088_v7 = vshll.u32 %v2671_v15, %v1073_v46 }
 0x24b   : > { %2111 = vst [vmem:[%s3138_s9 + $0x60] sm:$0xff] %v1786_v17  ;;  %v1247_v36 = vxor.u32 2147483648, %v1246_v0  ;;  %v1089_v20 = vshrl.u32 %v2672_v22, %v1074_v2  ;;  %v2058_v47 = vshll.u32 %v4025_v49, 30  ;;  %v1078_v54 = vor.u32 %v1077_v52, %v1076_v16 }
 0x24c   : > { %v1081_v57 = vor.u32 %v1080_v34, %v1079_v53  ;;  %v4034_v12 = vshll.u32 %v1067_v55, 8  ;;  %v1084_v37 = vor.u32 %v1083_v29, %v1082_v38  ;;  %v1087_v41 = vor.u32 %v1086_v56, %v1085_v14 }
 0x24d   : > { %v1248_v33 = vsel %vm1165_vm2, %v1247_v36, %v1246_v0  ;;  %v1090_v31 = vor.u32 %v1089_v20, %v1088_v7  ;;  %v1256_v51 = vadd.s32 3, %v1252_v4  ;;  %v2059_v24 = vsub.s32 %v2055_v23, %v2058_v47 }
 0x24e   : > { %v1251_v25 = vsel %vm3994_vm10, %v3758_v1, %v1248_v33  ;;  %v1894_v44 = vand.u32 2139095040, %v4012_v21  ;;  %v1075_v46 = vshrl.u32 %v2667_v5, %v1074_v2  ;;  %vm1091_vm13 = vcmp.lt.s32.totalorder %v1072_v59, 1 }
 0x24f   : > { %2569 = vcosq.f32 %v1251_v25  ;;  %vm1093_vm14 = vcmp.lt.s32.totalorder %v1072_v59, 3  ;;  %v2061_v27 = vsub.s32 0, %v2059_v24  ;;  %vm1094_vm15 = vcmp.lt.s32.totalorder %v1072_v59, 4 }
 0x250   : > { %2571 = vsinq.f32 %v1251_v25  ;;  %v1099_v45 = vsel %vm1091_vm13, %v1078_v54, %v1081_v57  ;;  %v1096_v63 = vsel %vm1094_vm15, %v1084_v37, 2102212464  ;;  %v1100_v40 = vsel %vm1094_vm15, %v1087_v41, 920167782 }
 0x251   : > { %v1103_v60 = vsel %vm1091_vm13, %v1081_v57, %v1084_v37  ;;  %v1104_v19 = vsel %vm1094_vm15, %v1090_v31, 1326507024  ;;  %v2294_v42 = vmin.u32 %v2061_v27, %v2059_v24  ;;  %vm1092_vm0 = vcmp.lt.s32.totalorder %v1072_v59, 2 }
 0x252   : > { %v1101_v43 = vsel %vm1093_vm14, %v1084_v37, %v1100_v40  ;;  %v1105_v18 = vsel %vm1093_vm14, %v1087_v41, %v1104_v19  ;;  %v1257_v50 = vand.u32 3, %v1256_v51  ;;  %v1895_v6 = vshrl.u32 %v1894_v44, 23 }
 0x253   : > { %v1102_v2 = vsel %vm1092_vm0, %v1099_v45, %v1101_v43  ;;  %v1106_v61 = vsel %vm1092_vm0, %v1103_v60, %v1105_v18  ;;  %v2063_v55 = vclz %v2294_v42  ;;  %v1095_v30 = vsel %vm1091_vm13, %v1075_v46, %v1078_v54 }
 0x254   : > { %v1097_v4 = vsel %vm1093_vm14, %v1081_v57, %v1096_v63  ;;  %v4052_v23 = vmul.u32.u64.low %v4034_v12, %v1106_v61  ;;  %v4053_v35 = vmul.u32.u64.high %v4034_v12, %v1106_v61, %v4052_v23  ;;  %v2289_v28 = vadd.s32 4294967169, %v1895_v6 }
 0x255   : > { %v4056_v62 = vmul.u32.u64.low %v4034_v12, %v1102_v2  ;;  %v4057_v32 = vmul.u32.u64.high %v4034_v12, %v1102_v2, %v4056_v62  ;;  %v2295_v26 = vadd.s32 4294967294, %v2063_v55  ;;  %vm1255_vm1 = vweird.f32 %v3758_v1 }
 0x256   : > { %vm1259_vm2 = vcmp.eq.s32.totalorder %v1257_v50, 0  ;;  %v1098_v52 = vsel %vm1092_vm0, %v1095_v30, %v1097_v4  ;;  %vm1262_vm3 = vcmp.eq.s32.totalorder %v1257_v50, 2  ;;  %v2051_v34 = vadd.s32 %v3978_v3, %v3987_v39 }
 0x257   : > { %vm2296_vm4 = vcmp.lt.s32.totalorder %v2295_v26, 0  ;;  %v1901_v17 = vadd.s32 1, %v2289_v28  ;;  %v2081_v29 = vsub.s32 4, %v4025_v49  ;;  %vm1116_vm5 = vc.u32 %v4053_v35, %v4056_v62 }
 0x258   : > { %v2066_v16 = vsel %vm2296_vm4, 0, %v2295_v26  ;;  %v1117_v53 = vadd.s32 1, %v4057_v32  ;;  %v1114_v14 = vmul.u32 %v4034_v12, %v1098_v52  ;;  %vm1258_vm8 = vcmp.lt.s32.totalorder %v1257_v50, 2 }
 0x259   : > { %v2570_v0 = vpop.eup %2569  ;;  %v2067_v36 = vsub.s32 32, %v2066_v16  ;;  %v2071_v59 = vsub.s32 4294967266, %v2066_v16  ;;  %v2068_v20 = vshll.u32 %v2059_v24, %v2066_v16  ;;  %vm1902_vm6 = vcmp.gt.s32.totalorder %v1901_v17, 0 }
 0x25a   : > { %v2572_v38 = vpop.eup %2571  ;;  %v1263_v56 = vxor.u32 2147483648, %v2570_v0  ;;  %v1118_v3 = vsel %vm1116_vm5, %v1117_v53, %v4057_v32  ;;  %v1891_v37 = vand.u32 2147483647, %v4012_v21  ;;  %v1903_v41 = vsel %vm1902_vm6, %v1901_v17, 0 }
 0x25b   : > { %v1260_v7 = vxor.u32 2147483648, %v2572_v38  ;;  %v2069_v47 = vshrl.u32 %v2051_v34, %v2067_v36  ;;  %v2072_v54 = vadd.s32 127, %v2071_v59  ;;  %v1119_v57 = vadd.s32 %v1118_v3, %v1114_v14 }
 0x25c   : > { %v1264_v39 = vsel %vm1262_vm3, %v1263_v56, %v2572_v38  ;;  %vm1997_vm7 = vcmp.lt.s32.totalorder %v3856_v10, 0  ;;  %v1905_v44 = vand.u32 31, %v1903_v41  ;;  %v1898_v63 = vand.u32 8388607, %v1891_v37 }
 0x25d   : > { %v1261_v33 = vsel %vm1259_vm2, %v2570_v0, %v1260_v7  ;;  %v2070_v25 = vor.u32 %v2069_v47, %v2068_v20  ;;  %v2073_v12 = vshll.u32 %v2072_v54, 23  ;;  %v1120_v51 = vadd.s32 536870912, %v1119_v57 }
 0x25e   : > { %v1265_v31 = vsel %vm1258_vm8, %v1261_v33, %v1264_v39  ;;  %v2082_v27 = vsel %vm1997_vm7, %v2081_v29, %v4025_v49  ;;  %v1906_v40 = vsub.s32 32, %v1905_v44  ;;  %vm4086_vm9 = vcmp.le.f32.partialorder %v1995_v58, 0.7853982 }
 0x25f   : > { %v1266_v24 = vsel %vm1255_vm1, nan, %v1265_v31  ;;  %v2074_v46 = vor.u32 4788187, %v2073_v12  ;;  %v4080_v45 = vshrl.u32 %v1120_v51, 30  ;;  %v2077_v19 = vcvt.s32.f32 %v2070_v25 }
 0x260   : > { %2106 = vst [vmem:[%s3138_s9 + $0x38] sm:$0xff] %v1266_v24  ;;  %v2084_v43 = vsel %vm4086_vm9, 0, %v2082_v27  ;;  %v1909_v49 = vshrl.u32 %v2668_v9, %v1906_v40  ;;  %v1912_v18 = vshrl.u32 %v2669_v11, %v1906_v40  ;;  %v1915_v50 = vshrl.u32 %v2670_v13, %v1906_v40 }
 0x261   : > { %v2075_v60 = vand.u32 2147483647, %v2074_v46  ;;  %v1122_v42 = vshll.u32 %v4080_v45, 30  ;;  %v1908_v58 = vshll.u32 %v2667_v5, %v1905_v44  ;;  %v1918_v6 = vshrl.u32 %v2671_v15, %v1906_v40 }
 0x262   : > { %v1899_v55 = vor.u32 8388608, %v1898_v63  ;;  %v1904_v30 = vshrl.u32 %v1903_v41, 5  ;;  %v1911_v4 = vshll.u32 %v2668_v9, %v1905_v44  ;;  %v1914_v23 = vshll.u32 %v2669_v11, %v1905_v44 }
 0x263   : > { %v2078_v2 = vmul.f32 %v2077_v19, %v2075_v60  ;;  %v1123_v61 = vsub.s32 %v1119_v57, %v1122_v42  ;;  %v1910_v28 = vor.u32 %v1909_v49, %v1908_v58  ;;  %v1917_v52 = vshll.u32 %v2670_v13, %v1905_v44 }
 0x264   : > { %v1913_v34 = vor.u32 %v1912_v18, %v1911_v4  ;;  %v1916_v17 = vor.u32 %v1915_v50, %v1914_v23  ;;  %v1920_v0 = vshll.u32 %v2671_v15, %v1905_v44  ;;  %v1921_v16 = vshrl.u32 %v2672_v22, %v1906_v40 }
 0x265   : > { %v2079_v32 = vxor.u32 2147483648, %v2078_v2  ;;  %v1125_v26 = vsub.s32 0, %v1123_v61  ;;  %v1919_v38 = vor.u32 %v1918_v6, %v1917_v52  ;;  %v2088_v11 = vadd.s32 3, %v2084_v43 }
 0x266   : > { %v1922_v56 = vor.u32 %v1921_v16, %v1920_v0  ;;  %v1939_v36 = vshll.u32 %v1899_v55, 8  ;;  %vm1923_vm10 = vcmp.lt.s32.totalorder %v1904_v30, 1  ;;  %vm1926_vm11 = vcmp.lt.s32.totalorder %v1904_v30, 4 }
 0x267   : > { %v2080_v29 = vsel %vm1997_vm7, %v2079_v32, %v2078_v2  ;;  %v2258_v53 = vmin.u32 %v1125_v26, %v1123_v61  ;;  %v1907_v15 = vshrl.u32 %v2667_v5, %v1906_v40  ;;  %v1928_v22 = vsel %vm1926_vm11, %v1916_v17, 2102212464 }
 0x268   : > { %v2083_v9 = vsel %vm4086_vm9, %v3856_v10, %v2080_v29  ;;  %v1931_v59 = vsel %vm1923_vm10, %v1910_v28, %v1913_v34  ;;  %vm1925_vm12 = vcmp.lt.s32.totalorder %v1904_v30, 3  ;;  %v1932_v7 = vsel %vm1926_vm11, %v1919_v38, 920167782 }
 0x269   : > { %2573 = vcosq.f32 %v2083_v9  ;;  %v1127_v13 = vclz %v2258_v53  ;;  %v1935_v20 = vsel %vm1923_vm10, %v1913_v34, %v1916_v17  ;;  %vm1924_vm13 = vcmp.lt.s32.totalorder %v1904_v30, 2 }
 0x26a   : > { %2575 = vsinq.f32 %v2083_v9  ;;  %v1927_v3 = vsel %vm1923_vm10, %v1907_v15, %v1910_v28  ;;  %v1933_v39 = vsel %vm1925_vm12, %v1916_v17, %v1932_v7  ;;  %v1936_v47 = vsel %vm1926_vm11, %v1922_v56, 1326507024 }
 0x26b   : > { %v2259_v14 = vadd.s32 4294967294, %v1127_v13  ;;  %v1929_v54 = vsel %vm1925_vm12, %v1913_v34, %v1928_v22  ;;  %v1934_v57 = vsel %vm1924_vm13, %v1931_v59, %v1933_v39  ;;  %v1937_v33 = vsel %vm1925_vm12, %v1919_v38, %v1936_v47 }
 0x26c   : > { %v1938_v31 = vsel %vm1924_vm13, %v1935_v20, %v1937_v33  ;;  %v4111_v25 = vmul.u32.u64.low %v1939_v36, %v1934_v57  ;;  %v4112_v5 = vmul.u32.u64.high %v1939_v36, %v1934_v57, %v4111_v25  ;;  %v1115_v12 = vadd.s32 %v4056_v62, %v4053_v35 }
 0x26d   : > { %vm2260_vm14 = vcmp.lt.s32.totalorder %v2259_v14, 0  ;;  %v2089_v44 = vand.u32 3, %v2088_v11  ;;  %v4116_v46 = vmul.u32.u64.low %v1939_v36, %v1938_v31  ;;  %v4117_v27 = vmul.u32.u64.high %v1939_v36, %v1938_v31, %v4116_v46 }
 0x26e   : > { %v1130_v41 = vsel %vm2260_vm14, 0, %v2259_v14  ;;  %v1930_v60 = vsel %vm1924_vm13, %v1927_v3, %v1929_v54  ;;  %v1949_v19 = vadd.s32 1, %v4112_v5  ;;  %vm2087_vm3 = vweird.f32 %v3856_v10 }
 0x26f   : > { %v1131_v51 = vsub.s32 32, %v1130_v41  ;;  %v1135_v24 = vsub.s32 4294967266, %v1130_v41  ;;  %v1132_v63 = vshll.u32 %v1123_v61, %v1130_v41  ;;  %v1946_v2 = vmul.u32 %v1939_v36, %v1930_v60 }
 0x270   : > { %vm1948_vm15 = vc.u32 %v4117_v27, %v4111_v25  ;;  %vm2094_vm0 = vcmp.eq.s32.totalorder %v2089_v44, 2  ;;  %vm2091_vm1 = vcmp.eq.s32.totalorder %v2089_v44, 0  ;;  %vm2090_vm2 = vcmp.lt.s32.totalorder %v2089_v44, 2 }
 0x271   : > { %v1133_v40 = vshrl.u32 %v1115_v12, %v1131_v51  ;;  %v1136_v1 = vadd.s32 127, %v1135_v24  ;;  %v1950_v61 = vsel %vm1948_vm15, %v1949_v19, %v4112_v5  ;;  %v1145_v52 = vsub.s32 4, %v4080_v45 }
 0x272   : > { %v1951_v6 = vadd.s32 %v1950_v61, %v1946_v2  ;;  %vm1061_vm4 = vcmp.lt.s32.totalorder %v3918_v8, 0  ;;  %vm1060_vm5 = vcmp.le.f32.partialorder %v1059_v48, 0.7853982  ;;  %v1947_v7 = vadd.s32 %v4111_v25, %v4117_v27 }
 0x273   : > { %v2574_v42 = vpop.eup %2573  ;;  %v1134_v43 = vor.u32 %v1133_v40, %v1132_v63  ;;  %v1137_v49 = vshll.u32 %v1136_v1, 23  ;;  %v1146_v29 = vsel %vm1061_vm4, %v1145_v52, %v4080_v45  ;;  %vm1151_vm10 = vweird.f32 %v3918_v8 }
 0x274   : > { %v2576_v18 = vpop.eup %2575  ;;  %v2095_v50 = vxor.u32 2147483648, %v2574_v42  ;;  %v1952_v32 = vadd.s32 536870912, %v1951_v6  ;;  %v1148_v38 = vsel %vm1060_vm5, 0, %v1146_v29  ;;  %vm1893_vm11 = vcmp.lt.s32.totalorder %v4012_v21, 0 }
 0x275   : > { %v2092_v35 = vxor.u32 2147483648, %v2576_v18  ;;  %v1138_v62 = vor.u32 4788187, %v1137_v49  ;;  %v1141_v4 = vcvt.s32.f32 %v1134_v43  ;;  %v1152_v56 = vadd.s32 3, %v1148_v38 }
 0x276   : > { %v2096_v58 = vsel %vm2094_vm0, %v2095_v50, %v2576_v18  ;;  %v1953_v34 = vshrl.u32 %v1952_v32, 30  ;;  %vm1892_vm12 = vcmp.le.f32.partialorder %v1891_v37, 0.7853982  ;;  %vm1983_vm0 = vweird.f32 %v4012_v21 }
 0x277   : > { %v2093_v55 = vsel %vm2091_vm1, %v2574_v42, %v2092_v35  ;;  %v1139_v30 = vand.u32 2147483647, %v1138_v62  ;;  %v1153_v15 = vand.u32 3, %v1152_v56 }
 0x278   : > { %v2097_v23 = vsel %vm2090_vm2, %v2093_v55, %v2096_v58  ;;  %v1954_v0 = vshll.u32 %v1953_v34, 30  ;;  %v1977_v46 = vsub.s32 4, %v1953_v34 }
 0x279   : > { %v2098_v26 = vsel %vm2087_vm3, nan, %v2097_v23  ;;  %v1142_v28 = vmul.f32 %v1141_v4, %v1139_v30  ;;  %vm1155_vm8 = vcmp.eq.s32.totalorder %v1153_v15, 0  ;;  %vm1158_vm7 = vcmp.eq.s32.totalorder %v1153_v15, 2 }
 0x27a   : > { %2114 = vst [vmem:[%s3138_s9 + $0x78] sm:$0xff] %v2098_v26  ;;  %v1955_v53 = vsub.s32 %v1951_v6, %v1954_v0  ;;  %vm1154_vm9 = vcmp.lt.s32.totalorder %v1153_v15, 2  ;;  %v1978_v40 = vsel %vm1893_vm11, %v1977_v46, %v1953_v34 }
 0x27b   : > { %v1143_v17 = vxor.u32 2147483648, %v1142_v28  ;;  %v1980_v1 = vsel %vm1892_vm12, 0, %v1978_v40 }
 0x27c   : > { %v1957_v9 = vsub.s32 0, %v1955_v53  ;;  %v1984_v60 = vadd.s32 3, %v1980_v1 }
 0x27d   : > { %v1144_v16 = vsel %vm1061_vm4, %v1143_v17, %v1142_v28 }
 0x27e   : > { %v1147_v10 = vsel %vm1060_vm5, %v3918_v8, %v1144_v16  ;;  %v2290_v11 = vmin.u32 %v1957_v9, %v1955_v53  ;;  %v1985_v19 = vand.u32 3, %v1984_v60 }
 0x27f   : > { %2577 = vcosq.f32 %v1147_v10 }
 0x280   : > { %2579 = vsinq.f32 %v1147_v10  ;;  %v1959_v36 = vclz %v2290_v11  ;;  %vm1990_vm13 = vcmp.eq.s32.totalorder %v1985_v19, 2  ;;  %vm1987_vm14 = vcmp.eq.s32.totalorder %v1985_v19, 0 }
 0x281   : > { %vm1986_vm15 = vcmp.lt.s32.totalorder %v1985_v19, 2 }
 0x282   : > { %v2291_v13 = vadd.s32 4294967294, %v1959_v36 }
 0x284   : > { %vm2292_vm6 = vcmp.lt.s32.totalorder %v2291_v13, 0 }
 0x285   : > { %v1962_v59 = vsel %vm2292_vm6, 0, %v2291_v13 }
 0x286   : > { %v1963_v45 = vsub.s32 32, %v1962_v59  ;;  %v1967_v20 = vsub.s32 4294967266, %v1962_v59  ;;  %v1964_v47 = vshll.u32 %v1955_v53, %v1962_v59 }
 0x288   : > { %v1965_v54 = vshrl.u32 %v1947_v7, %v1963_v45  ;;  %v1968_v57 = vadd.s32 127, %v1967_v20 }
 0x289   : > { %v2578_v22 = vpop.eup %2577 }
 0x28a   : > { %v2580_v14 = vpop.eup %2579  ;;  %v1159_v48 = vxor.u32 2147483648, %v2578_v22  ;;  %v1966_v31 = vor.u32 %v1965_v54, %v1964_v47  ;;  %v1969_v5 = vshll.u32 %v1968_v57, 23 }
 0x28b   : > { %v1156_v3 = vxor.u32 2147483648, %v2580_v14 }
 0x28c   : > { %v1160_v39 = vsel %vm1158_vm7, %v1159_v48, %v2580_v14  ;;  %v1970_v25 = vor.u32 4788187, %v1969_v5  ;;  %v1973_v24 = vcvt.s32.f32 %v1966_v31 }
 0x28d   : > { %v1157_v33 = vsel %vm1155_vm8, %v2578_v22, %v1156_v3 }
 0x28e   : > { %v1161_v41 = vsel %vm1154_vm9, %v1157_v33, %v1160_v39  ;;  %v1971_v51 = vand.u32 2147483647, %v1970_v25 }
 0x28f   : > { %v1162_v12 = vsel %vm1151_vm10, nan, %v1161_v41 }
 0x290   : > { %2105 = vst [vmem:[%s3138_s9 + $0x30] sm:$0xff] %v1162_v12  ;;  %v1974_v44 = vmul.f32 %v1973_v24, %v1971_v51 }
 0x292   : > { %v1975_v27 = vxor.u32 2147483648, %v1974_v44 }
 0x294   : > { %v1976_v63 = vsel %vm1893_vm11, %v1975_v27, %v1974_v44 }
 0x295   : > { %v1979_v8 = vsel %vm1892_vm12, %v4012_v21, %v1976_v63 }
 0x296   : > { %2581 = vcosq.f32 %v1979_v8 }
 0x297   : > { %2583 = vsinq.f32 %v1979_v8 }
 0x2a0   : > { %v2582_v42 = vpop.eup %2581 }
 0x2a1   : > { %v2584_v43 = vpop.eup %2583  ;;  %v1991_v49 = vxor.u32 2147483648, %v2582_v42  ;;  %2122 = sbr.rel (!%p2736_p4) target bundleno = 708 (0x2c4), region = 36 }
 0x2a2   : > { %v1988_v18 = vxor.u32 2147483648, %v2584_v43 }
 0x2a3   : > { %v1992_v50 = vsel %vm1990_vm13, %v1991_v49, %v2584_v43 }
 0x2a4   : > { %v1989_v37 = vsel %vm1987_vm14, %v2582_v42, %v1988_v18 }
 0x2a5   : > { %v1993_v2 = vsel %vm1986_vm15, %v1989_v37, %v1992_v50 }
 0x2a6   : > { %v1994_v35 = vsel %vm1983_vm0, nan, %v1993_v2 }
 0x2a7   : > { %2113 = vst [vmem:[%s3138_s9 + $0x70] sm:$0xff] %v1994_v35 }
 0x2a8   : > { %s4250_s23 = smov (!%p2125_p12, %s2124_s23), 16 }
 0x2a9   : > { %s4147_s26 = sshll.u32 %s4250_s23, 7 }
 0x2aa   : > { %s2129_s27 = ssub.s32 2048, %s4147_s26 }
 0x2ab   : > { %2130 = vsyncadd %s4142_s21, %s2129_s27  ;;  %p2300_p13 = scmp.ne.s32.totalorder %s4147_s26, 0  ;;  %s2306_s28 = sshll.u32 %s2657_s15, 11 }
 0x2ac   : > { %s4156_s30 = scalar_lea.hbm %s4211_s3, %s2306_s28  ;;  %s2136_s5 = sshll.u32 %s3138_s9, 4  ;;  %s4159_s5 = int_to_ptr.vmem [resolvable:$true] %s2136_s5 }
 0x2ad   : > { %s2587_s4 = scalar_lea.vmem %s4159_s5, %s4147_s26  ;;  %s2673_s6 = smov [#allocation2]  }
 0x2ae   : > { %p2588_p0 = scmp.ne.s32.totalorder %s4159_s5, %s2587_s4  ;;  %s2591_s7 = sshll.u32 %s2673_s6, 4  ;;  %s2592_s7 = int_to_ptr.vmem [resolvable:$false] %s2591_s7 }
 0x2af   : > { %s2593_s15 = scalar_lea.vmem %s2592_s7, 4096  ;;  %p2594_p3 = scmp.lt.s32.totalorder %s4159_s5, %s2592_s7 }
 0x2b0   : > { %p2589_p1 = pnand %p2588_p0, %p2300_p13  ;;  %p2595_p4 = scmp.lt.s32.totalorder %s2593_s15, %s2587_s4 }
 0x2b2   : > { %p2590_p2 = pneg %p2589_p1  ;;  %p2596_p5 = por %p2595_p4, %p2594_p3 }
 0x2b4   : > { %p2597_p6 = pnand %p2596_p5, %p2590_p2 }
 0x2b6   : > { %2600 = shalt.err (!%p2597_p6)
}
 0x2b7   : > { %s2601_s8 = scalar_lea.hbm %s4156_s30, %s4147_s26  ;;  %s2605_s11 = scalar_lea.hbm %s4211_s3, 4864 }
 0x2b8   : > { %p2602_p7 = scmp.ne.s32.totalorder %s4156_s30, %s2601_s8  ;;  %p2606_p11 = scmp.lt.u32.totalorder %s4156_s30, %s4211_s3 }
 0x2b9   : > { %p2607_p12 = scmp.lt.u32.totalorder %s2605_s11, %s2601_s8  ;;  %p2609_p1 = scmp.lt.u32.totalorder %s2601_s8, %s4156_s30 }
 0x2ba   : > { %p2603_p9 = pnand %p2602_p7, %p2300_p13 }
 0x2bb   : > { %p2608_p0 = por %p2607_p12, %p2606_p11 }
 0x2bc   : > { %p2604_p10 = pneg %p2603_p9 }
 0x2bd   : > { %p2610_p2 = por %p2609_p1, %p2608_p0 }
 0x2bf   : > { %p2611_p3 = pnand %p2610_p2, %p2604_p10 }
 0x2c1   : > { %2614 = shalt.err (!%p2611_p3)
}
 0x2c2   : > { %s2674_s23 = smov 128   ;;  %s2675_s27 = smov 8  }
 0x2c3   : > { %2142 = dma.vmem_to_hbm [thread:$0]  (%p2300_p13), %s4159_s5, %s4147_s26, %s4156_s30, %s4142_s21, %s2674_s23, %s2674_s23, %s2675_s27  }
 0x2c4 PF: > { %p2464_p4 = scmp.ge.s32.totalorder %s2665_s17, 2  ;;  %s2151_s28 = sand.u32 1, %s2645_s12  }
 0x2c5   : > { %s2152_s29 = scalar_lea.sflag [#allocation3], %s2151_s28 }
 0x2c6   : > { %p2461_p5 = pnand %p2464_p4, %p2743_p8 }
 0x2c8   : > { %2640 = dma.done.wait (!%p2461_p5), %s2152_s29, 2048  }
 0x2c9   : > { %2642 = vsyncadd (!%p2461_p5), %s2152_s29, 4294965248  ;;  %s16_s17 = sadd.s32 1, %s2665_s17   ;;  %s4242_s12 = smov %s2649_s13 }
 0x2ca   : > { %p13_p6 = scmp.ge.s32.totalorder %s16_s17, 5   ;;  %s4243_s13 = smov %s2653_s14 }
 0x2cb   : > { %s4244_s14 = smov %s2749_s25  ;;  %s4245_s15 = smov %s2661_s16 }
 0x2cc   : > { %s4246_s16 = smov %s4248_s20  ;;  %15 = sbr.rel (!%p13_p6) target bundleno = 4 (0x4), region = 67 }
 0x2d3   :  { %2157 = vsyncpa [#allocation3], 1 }
 0x2d4   :  { %2159 = vsyncpa [#allocation3 + $0x1], 1 }

</bundles_post_ra>
